<compile_context>
chip_gen: v6e
topology: v6e:2x2x1
jax: 0.10.0
libtpu: 0.0.40
codegen_flags: <defaults>
</compile_context>

<pallas_src>
import math
import jax
import jax.numpy as jnp
from jax.experimental import pallas as pl
from jax.experimental.pallas import tpu as pltpu


# ---------------------------------------------------------------------------
# Helpers
# ---------------------------------------------------------------------------
def _pack_col_vectors(vectors):
    """Concatenate 1-D vectors into one (total, 1) f32 column.  Each segment is
    padded to a multiple of 8 rows so every in-kernel sublane slice start is
    aligned."""
    chunks, offsets, off = [], [], 0
    for v in vectors:
        v = jnp.asarray(v, jnp.float32).reshape(-1)
        n = v.shape[0]
        npad = ((n + 7) // 8) * 8
        chunks.append(jnp.pad(v, (0, npad - n)))
        offsets.append(off)
        off += npad
    return jnp.concatenate(chunks).reshape(off, 1), offsets


# ---------------------------------------------------------------------------
# Wrapper + kernel
# ---------------------------------------------------------------------------
def graphconv2_forward(node, edge_index, edge, hidden, params, *, tile_e=1024):
    """Returns (update, hidden) exactly like GraphConv2.forward (eval-mode BN)."""
    num_edge, E = edge.shape
    node_dim = node.shape[1]
    f32, bf16 = jnp.float32, jnp.bfloat16

    # ---- tile selection: big tiles amortize per-step overhead; keep >= 2 grid
    # steps when the edge count allows so v7x can shard across its 2 TensorCores.
    req = max(128, (int(tile_e) // 128) * 128)
    half = ((pl.cdiv(num_edge, 2) + 127) // 128) * 128
    tile_e = min(req, max(128, half))

    grid_e = pl.cdiv(num_edge, tile_e)
    padded = grid_e * tile_e
    pad = padded - num_edge

    # ---- glue in plain JAX: gather + concat directly in feature-major layout ----
    ei = edge_index.T
    node_t = node.T.astype(bf16)                                   # (node_dim, num_node)
    x_t = jnp.concatenate([jnp.take(node_t, ei[0], axis=1),
                           jnp.take(node_t, ei[1], axis=1)], axis=0)   # (2*node_dim, nE)
    edge_t = edge.T.astype(bf16)                                   # (E, nE)
    h_t = hidden.reshape(num_edge, E).T.astype(f32)                # (E, nE)

    if pad:
        x_t = jnp.pad(x_t, ((0, 0), (0, pad)))
        edge_t = jnp.pad(edge_t, ((0, 0), (0, pad)))
        h_t = jnp.pad(h_t, ((0, 0), (0, pad)))

    # ---- fold eval-mode BatchNorm into the (out, in) weights (scale) + shift ----
    def fold_bn(gamma, beta, mean, var, eps=1e-5):
        s = gamma / jnp.sqrt(var + eps)
        return s, beta - mean * s

    w_fm, shifts = [], []
    for W, bn in params["encoder"]:
        s, t = fold_bn(*bn)
        w_fm.append((W * s[:, None]).astype(bf16))   # (out, in), BN scale folded
        shifts.append(t)
    W1s, W2s, W3s, W4s = w_fm
    d1, d2, d3, d4 = (w.shape[0] for w in w_fm)       # 256, 256, 128, E*E

    # ---- GRU weights (PyTorch gate order r|z|n), kept (3E, E) for feature-major ----
    Wih, Whh, bih, bhh = params["gru"]
    Wih_b = Wih.astype(bf16)                          # (3E, E)
    Whh_b = Whh.astype(bf16)                          # (3E, E)

    # ---- constant matrices routing the per-edge mat-vec through the MXU ----
    # e_rep[k*E+j, e] = edge[k, e]  via  R2 @ edge_t ;  msg = S2 @ (e_rep * a4)
    R2 = jnp.repeat(jnp.eye(E, dtype=f32), E, axis=0).astype(bf16)   # (E*E, E)
    S2 = jnp.tile(jnp.eye(E, dtype=f32), (1, E)).astype(bf16)        # (E, E*E)

    # ---- pack all per-feature shift vectors into one sublane-aligned column ----
    col, offs = _pack_col_vectors(
        [shifts[0], shifts[1], shifts[2], shifts[3], params["bias"], bih, bhh])
    o_t1, o_t2, o_t3, o_t4, o_bias, o_bih, o_bhh = offs

    def kernel(x_ref, e_ref, h_ref,
               w1, w2, w3, w4, rmat, smat, wih, whh, c_ref,
               out_ref):
        # ---- encoder: 3x LinearBn+ReLU, 1x LinearBn (BN scale folded into W) ----
        a = jnp.dot(w1[...], x_ref[...], preferred_element_type=f32)
        a = jnp.maximum(a + c_ref[o_t1:o_t1 + d1, :], 0.0).astype(bf16)
        a = jnp.dot(w2[...], a, preferred_element_type=f32)
        a = jnp.maximum(a + c_ref[o_t2:o_t2 + d2, :], 0.0).astype(bf16)
        a = jnp.dot(w3[...], a, preferred_element_type=f32)
        a = jnp.maximum(a + c_ref[o_t3:o_t3 + d3, :], 0.0).astype(bf16)
        a4 = (jnp.dot(w4[...], a, preferred_element_type=f32)
              + c_ref[o_t4:o_t4 + d4, :])             # (E*E, tile_e), row m = k*E + j

        # ---- per-edge mat-vec on the MXU: msg[j,e] = sum_k edge[k,e] * A[e,k,j] ----
        e_rep = jnp.dot(rmat[...], e_ref[...], preferred_element_type=f32)   # (E*E, t)
        prod = (e_rep * a4).astype(bf16)
        msg = jnp.dot(smat[...], prod, preferred_element_type=f32)           # (E, t)
        msg = jnp.maximum(msg + c_ref[o_bias:o_bias + E, :], 0.0)

        # ---- single-step GRU cell (gate order r, z, n); lane-dense f32 elementwise ----
        h = h_ref[...]
        gi = (jnp.dot(wih[...], msg.astype(bf16), preferred_element_type=f32)
              + c_ref[o_bih:o_bih + 3 * E, :])
        gh = (jnp.dot(whh[...], h.astype(bf16), preferred_element_type=f32)
              + c_ref[o_bhh:o_bhh + 3 * E, :])
        r = jax.nn.sigmoid(gi[0:E, :] + gh[0:E, :])
        z = jax.nn.sigmoid(gi[E:2 * E, :] + gh[E:2 * E, :])
        n = jnp.tanh(gi[2 * E:3 * E, :] + r * gh[2 * E:3 * E, :])
        out_ref[...] = (1.0 - z) * n + z * h                                  # dense store

    full_args = [W1s, W2s, W3s, W4s, R2, S2, Wih_b, Whh_b, col]

    in_specs = [
        pl.BlockSpec((2 * node_dim, tile_e), lambda i: (0, i)),
        pl.BlockSpec((E, tile_e), lambda i: (0, i)),
        pl.BlockSpec((E, tile_e), lambda i: (0, i)),
    ] + [pl.BlockSpec(a.shape, lambda i: (0, 0)) for a in full_args]

    flops = 2 * padded * (2 * node_dim * d1 + d1 * d2 + d2 * d3 + d3 * d4
                          + E * d4 + d4 * E + 2 * E * 3 * E)
    bytes_accessed = (x_t.size * 2 + edge_t.size * 2 + h_t.size * 4
                      + padded * E * 4
                      + sum(int(a.size) * a.dtype.itemsize for a in full_args))

    out = pl.pallas_call(
        kernel,
        out_shape=jax.ShapeDtypeStruct((E, padded), f32),
        grid_spec=pltpu.PrefetchScalarGridSpec(
            num_scalar_prefetch=0,
            grid=(grid_e,),
            in_specs=in_specs,
            out_specs=pl.BlockSpec((E, tile_e), lambda i: (0, i)),
        ),
        compiler_params=pltpu.CompilerParams(
            dimension_semantics=("parallel",)),
        cost_estimate=pl.CostEstimate(flops=int(flops),
                                      transcendentals=int(padded * 3 * E),
                                      bytes_accessed=int(bytes_accessed)),
    )(x_t, edge_t, h_t, *full_args)

    # back to edge-major; update and the GRU hidden state are identical for one step.
    update = out[:, :num_edge].T
    return update, update.reshape(1, num_edge, E)


# ---------------------------------------------------------------------------
# Pure-JAX f32 reference (for correctness check)
# ---------------------------------------------------------------------------
def graphconv2_reference(node, edge_index, edge, hidden, params):
    num_edge, E = edge.shape
    ei = edge_index.T
    x_ij = jnp.concatenate([node[ei[0]], node[ei[1]]], axis=1)

    def fold_bn(gamma, beta, mean, var, eps=1e-5):
        s = gamma / jnp.sqrt(var + eps)
        return s, beta - mean * s

    a = x_ij
    for idx, (W, bn) in enumerate(params["encoder"]):
        s, t = fold_bn(*bn)
        a = a @ W.T * s + t
        if idx < 3:
            a = jnp.maximum(a, 0.0)
    A = a.reshape(num_edge, E, E)
    msg = jnp.einsum("ek,ekj->ej", edge, A)
    msg = jnp.maximum(msg + params["bias"], 0.0)

    Wih, Whh, bih, bhh = params["gru"]
    h = hidden.reshape(num_edge, E)
    gi = msg @ Wih.T + bih
    gh = h @ Whh.T + bhh
    r = jax.nn.sigmoid(gi[:, :E] + gh[:, :E])
    z = jax.nn.sigmoid(gi[:, E:2 * E] + gh[:, E:2 * E])
    n = jnp.tanh(gi[:, 2 * E:] + r * gh[:, 2 * E:])
    h_new = (1.0 - z) * n + z * h
    return h_new, h_new.reshape(1, num_edge, E)


# ---------------------------------------------------------------------------
# Deterministic parameter construction (synthetic; matches __init__ shapes)
# ---------------------------------------------------------------------------
def make_params(key, node_dim, edge_dim):
    dims = [(node_dim * 2, 256), (256, 256), (256, 128), (128, edge_dim * edge_dim)]
    keys = jax.random.split(key, 32)
    ki = iter(keys)
    encoder = []
    for (cin, cout) in dims:
        W = jax.random.normal(next(ki), (cout, cin), jnp.float32) * (1.0 / math.sqrt(cin))
        gamma = 1.0 + 0.1 * jax.random.normal(next(ki), (cout,), jnp.float32)
        beta = 0.1 * jax.random.normal(next(ki), (cout,), jnp.float32)
        mean = 0.1 * jax.random.normal(next(ki), (cout,), jnp.float32)
        var = 0.5 + jax.random.uniform(next(ki), (cout,), jnp.float32)
        encoder.append((W, (gamma, beta, mean, var)))

    E = edge_dim
    k_gru = 1.0 / math.sqrt(E)
    Wih = jax.random.uniform(next(ki), (3 * E, E), jnp.float32, -k_gru, k_gru)
    Whh = jax.random.uniform(next(ki), (3 * E, E), jnp.float32, -k_gru, k_gru)
    bih = jax.random.uniform(next(ki), (3 * E,), jnp.float32, -k_gru, k_gru)
    bhh = jax.random.uniform(next(ki), (3 * E,), jnp.float32, -k_gru, k_gru)
    bias = jax.random.uniform(next(ki), (E,), jnp.float32, -k_gru, k_gru)

    return {"encoder": encoder, "gru": (Wih, Whh, bih, bhh), "bias": bias}


if __name__ == "__main__":
    node_dim = 16
    edge_dim = 8
    num_node = 64
    num_edge = 500   # not a multiple of the tile -> exercises pad+drop and grid>=2 path

    key = jax.random.PRNGKey(0)
    k_node, k_ei, k_edge, k_hid, k_par = jax.random.split(key, 5)

    node = jax.random.normal(k_node, (num_node, node_dim), jnp.float32)
    edge_index = jax.random.randint(k_ei, (num_edge, 2), 0, num_node, jnp.int32)
    edge = jax.random.normal(k_edge, (num_edge, edge_dim), jnp.float32)
    hidden = jax.random.normal(k_hid, (1, num_edge, edge_dim), jnp.float32)
    params = make_params(k_par, node_dim, edge_dim)

    update, h_new = graphconv2_forward(node, edge_index, edge, hidden, params, tile_e=1024)
    update = jax.block_until_ready(update)
    h_new = jax.block_until_ready(h_new)

    upd_ref, h_ref = graphconv2_reference(node, edge_index, edge, hidden, params)
    assert update.shape == (num_edge, edge_dim)
    assert h_new.shape == (1, num_edge, edge_dim)
    # bf16 MXU inputs with f32 accumulation -> relaxed tolerance vs. the f32 reference.
    assert jnp.allclose(update, upd_ref, atol=5e-2, rtol=5e-2)
    assert jnp.allclose(h_new, h_ref, atol=5e-2, rtol=5e-2)

    print("KERNEL_OK")
</pallas_src>

<mosaic_0001>
module attributes {stable_mosaic.version = 11 : i64} {
  func.func @kernel(%arg0: i32, %arg1: memref<32x256xbf16, #tpu.memory_space<vmem>>, %arg2: memref<8x256xbf16, #tpu.memory_space<vmem>>, %arg3: memref<8x256xf32, #tpu.memory_space<vmem>>, %arg4: memref<256x32xbf16, #tpu.memory_space<vmem>>, %arg5: memref<256x256xbf16, #tpu.memory_space<vmem>>, %arg6: memref<128x256xbf16, #tpu.memory_space<vmem>>, %arg7: memref<64x128xbf16, #tpu.memory_space<vmem>>, %arg8: memref<64x8xbf16, #tpu.memory_space<vmem>>, %arg9: memref<8x64xbf16, #tpu.memory_space<vmem>>, %arg10: memref<24x8xbf16, #tpu.memory_space<vmem>>, %arg11: memref<24x8xbf16, #tpu.memory_space<vmem>>, %arg12: memref<760x1xf32, #tpu.memory_space<vmem>>, %arg13: memref<8x256xf32, #tpu.memory_space<vmem>>) attributes {dimension_semantics = [#tpu.dimension_semantics<parallel>], iteration_bounds = array<i64: 2>, scalar_prefetch = 0 : i64, scratch_operands = 0 : i64, tpu.core_type = #tpu.core_type<tc>, window_params = [{transform_indices = @transform_0, window_bounds = array<i64: 32, 256>}, {transform_indices = @transform_1, window_bounds = array<i64: 8, 256>}, {transform_indices = @transform_2, window_bounds = array<i64: 8, 256>}, {pipeline_mode = #tpu.pipeline_mode<synchronous>, transform_indices = @transform_3, window_bounds = array<i64: 256, 32>}, {pipeline_mode = #tpu.pipeline_mode<synchronous>, transform_indices = @transform_4, window_bounds = array<i64: 256, 256>}, {pipeline_mode = #tpu.pipeline_mode<synchronous>, transform_indices = @transform_5, window_bounds = array<i64: 128, 256>}, {pipeline_mode = #tpu.pipeline_mode<synchronous>, transform_indices = @transform_6, window_bounds = array<i64: 64, 128>}, {pipeline_mode = #tpu.pipeline_mode<synchronous>, transform_indices = @transform_7, window_bounds = array<i64: 64, 8>}, {pipeline_mode = #tpu.pipeline_mode<synchronous>, transform_indices = @transform_8, window_bounds = array<i64: 8, 64>}, {pipeline_mode = #tpu.pipeline_mode<synchronous>, transform_indices = @transform_9, window_bounds = array<i64: 24, 8>}, {pipeline_mode = #tpu.pipeline_mode<synchronous>, transform_indices = @transform_10, window_bounds = array<i64: 24, 8>}, {pipeline_mode = #tpu.pipeline_mode<synchronous>, transform_indices = @transform_11, window_bounds = array<i64: 760, 1>}, {transform_indices = @transform_12, window_bounds = array<i64: 8, 256>}]} {
    %c0 = arith.constant 0 : index
    %c0_0 = arith.constant 0 : index
    %0 = vector.load %arg4[%c0, %c0_0] : memref<256x32xbf16, #tpu.memory_space<vmem>>, vector<256x32xbf16>
    %c0_1 = arith.constant 0 : index
    %c0_2 = arith.constant 0 : index
    %1 = vector.load %arg1[%c0_1, %c0_2] : memref<32x256xbf16, #tpu.memory_space<vmem>>, vector<32x256xbf16>
    %cst = arith.constant dense<0.000000e+00> : vector<256x256xf32>
    %2 = tpu.matmul %0, %1, %cst {dimension_numbers = #tpu.dot_dimension_numbers<[1], [0], [0], [1], [0, 0, 1, 1], [], []>} : vector<256x32xbf16>, vector<32x256xbf16>, vector<256x256xf32> -> vector<256x256xf32>
    %c0_3 = arith.constant 0 : index
    %c0_4 = arith.constant 0 : index
    %3 = vector.load %arg12[%c0_3, %c0_4] : memref<760x1xf32, #tpu.memory_space<vmem>>, vector<256x1xf32>
    %4 = vector.broadcast %3 : vector<256x1xf32> to vector<256x256xf32>
    %5 = arith.addf %2, %4 : vector<256x256xf32>
    %cst_5 = arith.constant 0.000000e+00 : f32
    %6 = vector.broadcast %cst_5 : f32 to vector<256x256xf32>
    %7 = arith.maximumf %5, %6 : vector<256x256xf32>
    %8 = arith.truncf %7 : vector<256x256xf32> to vector<256x256xbf16>
    %c0_6 = arith.constant 0 : index
    %c0_7 = arith.constant 0 : index
    %9 = vector.load %arg5[%c0_6, %c0_7] : memref<256x256xbf16, #tpu.memory_space<vmem>>, vector<256x256xbf16>
    %cst_8 = arith.constant dense<0.000000e+00> : vector<256x256xf32>
    %10 = tpu.matmul %9, %8, %cst_8 {dimension_numbers = #tpu.dot_dimension_numbers<[1], [0], [0], [1], [0, 0, 1, 1], [], []>} : vector<256x256xbf16>, vector<256x256xbf16>, vector<256x256xf32> -> vector<256x256xf32>
    %c256 = arith.constant 256 : index
    %c0_9 = arith.constant 0 : index
    %11 = vector.load %arg12[%c256, %c0_9] : memref<760x1xf32, #tpu.memory_space<vmem>>, vector<256x1xf32>
    %12 = vector.broadcast %11 : vector<256x1xf32> to vector<256x256xf32>
    %13 = arith.addf %10, %12 : vector<256x256xf32>
    %cst_10 = arith.constant 0.000000e+00 : f32
    %14 = vector.broadcast %cst_10 : f32 to vector<256x256xf32>
    %15 = arith.maximumf %13, %14 : vector<256x256xf32>
    %16 = arith.truncf %15 : vector<256x256xf32> to vector<256x256xbf16>
    %c0_11 = arith.constant 0 : index
    %c0_12 = arith.constant 0 : index
    %17 = vector.load %arg6[%c0_11, %c0_12] : memref<128x256xbf16, #tpu.memory_space<vmem>>, vector<128x256xbf16>
    %cst_13 = arith.constant dense<0.000000e+00> : vector<128x256xf32>
    %18 = tpu.matmul %17, %16, %cst_13 {dimension_numbers = #tpu.dot_dimension_numbers<[1], [0], [0], [1], [0, 0, 1, 1], [], []>} : vector<128x256xbf16>, vector<256x256xbf16>, vector<128x256xf32> -> vector<128x256xf32>
    %c512 = arith.constant 512 : index
    %c0_14 = arith.constant 0 : index
    %19 = vector.load %arg12[%c512, %c0_14] : memref<760x1xf32, #tpu.memory_space<vmem>>, vector<128x1xf32>
    %20 = vector.broadcast %19 : vector<128x1xf32> to vector<128x256xf32>
    %21 = arith.addf %18, %20 : vector<128x256xf32>
    %cst_15 = arith.constant 0.000000e+00 : f32
    %22 = vector.broadcast %cst_15 : f32 to vector<128x256xf32>
    %23 = arith.maximumf %21, %22 : vector<128x256xf32>
    %24 = arith.truncf %23 : vector<128x256xf32> to vector<128x256xbf16>
    %c0_16 = arith.constant 0 : index
    %c0_17 = arith.constant 0 : index
    %25 = vector.load %arg7[%c0_16, %c0_17] : memref<64x128xbf16, #tpu.memory_space<vmem>>, vector<64x128xbf16>
    %cst_18 = arith.constant dense<0.000000e+00> : vector<64x256xf32>
    %26 = tpu.matmul %25, %24, %cst_18 {dimension_numbers = #tpu.dot_dimension_numbers<[1], [0], [0], [1], [0, 0, 1, 1], [], []>} : vector<64x128xbf16>, vector<128x256xbf16>, vector<64x256xf32> -> vector<64x256xf32>
    %c640 = arith.constant 640 : index
    %c0_19 = arith.constant 0 : index
    %27 = vector.load %arg12[%c640, %c0_19] : memref<760x1xf32, #tpu.memory_space<vmem>>, vector<64x1xf32>
    %28 = vector.broadcast %27 : vector<64x1xf32> to vector<64x256xf32>
    %29 = arith.addf %26, %28 : vector<64x256xf32>
    %c0_20 = arith.constant 0 : index
    %c0_21 = arith.constant 0 : index
    %30 = vector.load %arg8[%c0_20, %c0_21] : memref<64x8xbf16, #tpu.memory_space<vmem>>, vector<64x8xbf16>
    %c0_22 = arith.constant 0 : index
    %c0_23 = arith.constant 0 : index
    %31 = vector.load %arg2[%c0_22, %c0_23] : memref<8x256xbf16, #tpu.memory_space<vmem>>, vector<8x256xbf16>
    %cst_24 = arith.constant dense<0.000000e+00> : vector<64x256xf32>
    %32 = tpu.matmul %30, %31, %cst_24 {dimension_numbers = #tpu.dot_dimension_numbers<[1], [0], [0], [1], [0, 0, 1, 1], [], []>} : vector<64x8xbf16>, vector<8x256xbf16>, vector<64x256xf32> -> vector<64x256xf32>
    %33 = arith.mulf %32, %29 : vector<64x256xf32>
    %34 = arith.truncf %33 : vector<64x256xf32> to vector<64x256xbf16>
    %c0_25 = arith.constant 0 : index
    %c0_26 = arith.constant 0 : index
    %35 = vector.load %arg9[%c0_25, %c0_26] : memref<8x64xbf16, #tpu.memory_space<vmem>>, vector<8x64xbf16>
    %cst_27 = arith.constant dense<0.000000e+00> : vector<8x256xf32>
    %36 = tpu.matmul %35, %34, %cst_27 {dimension_numbers = #tpu.dot_dimension_numbers<[1], [0], [0], [1], [0, 0, 1, 1], [], []>} : vector<8x64xbf16>, vector<64x256xbf16>, vector<8x256xf32> -> vector<8x256xf32>
    %c704 = arith.constant 704 : index
    %c0_28 = arith.constant 0 : index
    %37 = vector.load %arg12[%c704, %c0_28] : memref<760x1xf32, #tpu.memory_space<vmem>>, vector<8x1xf32>
    %38 = vector.broadcast %37 : vector<8x1xf32> to vector<8x256xf32>
    %39 = arith.addf %36, %38 : vector<8x256xf32>
    %cst_29 = arith.constant 0.000000e+00 : f32
    %40 = vector.broadcast %cst_29 : f32 to vector<8x256xf32>
    %41 = arith.maximumf %39, %40 : vector<8x256xf32>
    %c0_30 = arith.constant 0 : index
    %c0_31 = arith.constant 0 : index
    %42 = vector.load %arg3[%c0_30, %c0_31] : memref<8x256xf32, #tpu.memory_space<vmem>>, vector<8x256xf32>
    %c0_32 = arith.constant 0 : index
    %c0_33 = arith.constant 0 : index
    %43 = vector.load %arg10[%c0_32, %c0_33] : memref<24x8xbf16, #tpu.memory_space<vmem>>, vector<24x8xbf16>
    %44 = arith.truncf %41 : vector<8x256xf32> to vector<8x256xbf16>
    %cst_34 = arith.constant dense<0.000000e+00> : vector<24x256xf32>
    %45 = tpu.matmul %43, %44, %cst_34 {dimension_numbers = #tpu.dot_dimension_numbers<[1], [0], [0], [1], [0, 0, 1, 1], [], []>} : vector<24x8xbf16>, vector<8x256xbf16>, vector<24x256xf32> -> vector<24x256xf32>
    %c712 = arith.constant 712 : index
    %c0_35 = arith.constant 0 : index
    %46 = vector.load %arg12[%c712, %c0_35] : memref<760x1xf32, #tpu.memory_space<vmem>>, vector<24x1xf32>
    %47 = vector.broadcast %46 : vector<24x1xf32> to vector<24x256xf32>
    %48 = arith.addf %45, %47 : vector<24x256xf32>
    %c0_36 = arith.constant 0 : index
    %c0_37 = arith.constant 0 : index
    %49 = vector.load %arg11[%c0_36, %c0_37] : memref<24x8xbf16, #tpu.memory_space<vmem>>, vector<24x8xbf16>
    %50 = arith.truncf %42 : vector<8x256xf32> to vector<8x256xbf16>
    %cst_38 = arith.constant dense<0.000000e+00> : vector<24x256xf32>
    %51 = tpu.matmul %49, %50, %cst_38 {dimension_numbers = #tpu.dot_dimension_numbers<[1], [0], [0], [1], [0, 0, 1, 1], [], []>} : vector<24x8xbf16>, vector<8x256xbf16>, vector<24x256xf32> -> vector<24x256xf32>
    %c736 = arith.constant 736 : index
    %c0_39 = arith.constant 0 : index
    %52 = vector.load %arg12[%c736, %c0_39] : memref<760x1xf32, #tpu.memory_space<vmem>>, vector<24x1xf32>
    %53 = vector.broadcast %52 : vector<24x1xf32> to vector<24x256xf32>
    %54 = arith.addf %51, %53 : vector<24x256xf32>
    %55 = vector.extract_strided_slice %48 {offsets = [0, 0], sizes = [8, 256], strides = [1, 1]} : vector<24x256xf32> to vector<8x256xf32>
    %56 = vector.extract_strided_slice %54 {offsets = [0, 0], sizes = [8, 256], strides = [1, 1]} : vector<24x256xf32> to vector<8x256xf32>
    %57 = arith.addf %55, %56 : vector<8x256xf32>
    %58 = arith.negf %57 : vector<8x256xf32>
    %59 = math.exp %58 : vector<8x256xf32>
    %cst_40 = arith.constant 1.000000e+00 : f32
    %60 = vector.broadcast %cst_40 : f32 to vector<8x256xf32>
    %61 = arith.addf %60, %59 : vector<8x256xf32>
    %62 = arith.divf %60, %61 : vector<8x256xf32>
    %63 = vector.extract_strided_slice %48 {offsets = [8, 0], sizes = [8, 256], strides = [1, 1]} : vector<24x256xf32> to vector<8x256xf32>
    %64 = vector.extract_strided_slice %54 {offsets = [8, 0], sizes = [8, 256], strides = [1, 1]} : vector<24x256xf32> to vector<8x256xf32>
    %65 = arith.addf %63, %64 : vector<8x256xf32>
    %66 = arith.negf %65 : vector<8x256xf32>
    %67 = math.exp %66 : vector<8x256xf32>
    %cst_41 = arith.constant 1.000000e+00 : f32
    %68 = vector.broadcast %cst_41 : f32 to vector<8x256xf32>
    %69 = arith.addf %68, %67 : vector<8x256xf32>
    %70 = arith.divf %68, %69 : vector<8x256xf32>
    %71 = vector.extract_strided_slice %48 {offsets = [16, 0], sizes = [8, 256], strides = [1, 1]} : vector<24x256xf32> to vector<8x256xf32>
    %72 = vector.extract_strided_slice %54 {offsets = [16, 0], sizes = [8, 256], strides = [1, 1]} : vector<24x256xf32> to vector<8x256xf32>
    %73 = arith.mulf %62, %72 : vector<8x256xf32>
    %74 = arith.addf %71, %73 : vector<8x256xf32>
    %75 = math.tanh %74 : vector<8x256xf32>
    %cst_42 = arith.constant 1.000000e+00 : f32
    %76 = vector.broadcast %cst_42 : f32 to vector<8x256xf32>
    %77 = arith.subf %76, %70 : vector<8x256xf32>
    %78 = arith.mulf %77, %75 : vector<8x256xf32>
    %79 = arith.mulf %70, %42 : vector<8x256xf32>
    %80 = arith.addf %78, %79 : vector<8x256xf32>
    %c0_43 = arith.constant 0 : index
    %c0_44 = arith.constant 0 : index
    %81 = vector.load %arg13[%c0_43, %c0_44] : memref<8x256xf32, #tpu.memory_space<vmem>>, vector<8x256xf32>
    tpu.vector_store %arg13[%c0_43, %c0_44], %80 {strides = array<i32>} : memref<8x256xf32, #tpu.memory_space<vmem>>, vector<8x256xf32>,
    return
  }
  func.func @transform_0(%arg0: i32) -> (i32, i32) {
    %c0_i32 = arith.constant 0 : i32
    %c0_i32_0 = arith.constant 0 : i32
    return %c0_i32, %arg0 : i32, i32
  }
  func.func @transform_1(%arg0: i32) -> (i32, i32) {
    %c0_i32 = arith.constant 0 : i32
    %c0_i32_0 = arith.constant 0 : i32
    return %c0_i32, %arg0 : i32, i32
  }
  func.func @transform_2(%arg0: i32) -> (i32, i32) {
    %c0_i32 = arith.constant 0 : i32
    %c0_i32_0 = arith.constant 0 : i32
    return %c0_i32, %arg0 : i32, i32
  }
  func.func @transform_3(%arg0: i32) -> (i32, i32) {
    %c0_i32 = arith.constant 0 : i32
    %c0_i32_0 = arith.constant 0 : i32
    %c0_i32_1 = arith.constant 0 : i32
    return %c0_i32, %c0_i32_0 : i32, i32
  }
  func.func @transform_4(%arg0: i32) -> (i32, i32) {
    %c0_i32 = arith.constant 0 : i32
    %c0_i32_0 = arith.constant 0 : i32
    %c0_i32_1 = arith.constant 0 : i32
    return %c0_i32, %c0_i32_0 : i32, i32
  }
  func.func @transform_5(%arg0: i32) -> (i32, i32) {
    %c0_i32 = arith.constant 0 : i32
    %c0_i32_0 = arith.constant 0 : i32
    %c0_i32_1 = arith.constant 0 : i32
    return %c0_i32, %c0_i32_0 : i32, i32
  }
  func.func @transform_6(%arg0: i32) -> (i32, i32) {
    %c0_i32 = arith.constant 0 : i32
    %c0_i32_0 = arith.constant 0 : i32
    %c0_i32_1 = arith.constant 0 : i32
    return %c0_i32, %c0_i32_0 : i32, i32
  }
  func.func @transform_7(%arg0: i32) -> (i32, i32) {
    %c0_i32 = arith.constant 0 : i32
    %c0_i32_0 = arith.constant 0 : i32
    %c0_i32_1 = arith.constant 0 : i32
    return %c0_i32, %c0_i32_0 : i32, i32
  }
  func.func @transform_8(%arg0: i32) -> (i32, i32) {
    %c0_i32 = arith.constant 0 : i32
    %c0_i32_0 = arith.constant 0 : i32
    %c0_i32_1 = arith.constant 0 : i32
    return %c0_i32, %c0_i32_0 : i32, i32
  }
  func.func @transform_9(%arg0: i32) -> (i32, i32) {
    %c0_i32 = arith.constant 0 : i32
    %c0_i32_0 = arith.constant 0 : i32
    %c0_i32_1 = arith.constant 0 : i32
    return %c0_i32, %c0_i32_0 : i32, i32
  }
  func.func @transform_10(%arg0: i32) -> (i32, i32) {
    %c0_i32 = arith.constant 0 : i32
    %c0_i32_0 = arith.constant 0 : i32
    %c0_i32_1 = arith.constant 0 : i32
    return %c0_i32, %c0_i32_0 : i32, i32
  }
  func.func @transform_11(%arg0: i32) -> (i32, i32) {
    %c0_i32 = arith.constant 0 : i32
    %c0_i32_0 = arith.constant 0 : i32
    %c0_i32_1 = arith.constant 0 : i32
    return %c0_i32, %c0_i32_0 : i32, i32
  }
  func.func @transform_12(%arg0: i32) -> (i32, i32) {
    %c0_i32 = arith.constant 0 : i32
    %c0_i32_0 = arith.constant 0 : i32
    return %c0_i32, %arg0 : i32, i32
  }
}

</mosaic_0001>

<bundles_post_ra>
// kernel: tpu_custom_call.1
= control target key start
LH: loop header
LB: loop body
LE: loop exit
PB: predicated region body
PF: predicated region fallthrough
CT: control target
= control target key end

     0   :  { %s4496_s0 = inlined_call_operand.vmem [shape: bf16[32,512], index: 0, kind: input, shape index: {}]   ;;  %s4497_s1 = inlined_call_operand.vmem [shape: bf16[8,512], index: 1, kind: input, shape index: {}]   ;;  %s4498_s2 = inlined_call_operand.vmem [shape: f32[8,512], index: 2, kind: input, shape index: {}]   ;;  %s4499_s3 = inlined_call_operand.vmem [shape: bf16[256,32], index: 3, kind: input, shape index: {}]   ;;  %s4500_s4 = inlined_call_operand.vmem [shape: bf16[256,256], index: 4, kind: input, shape index: {}]   ;;  %s4501_s5 = inlined_call_operand.vmem [shape: bf16[128,256], index: 5, kind: input, shape index: {}]   ;;  %s4502_s6 = inlined_call_operand.vmem [shape: bf16[64,128], index: 6, kind: input, shape index: {}]   ;;  %s4503_s7 = inlined_call_operand.vmem [shape: bf16[64,8], index: 7, kind: input, shape index: {}]   ;;  %s4504_s8 = inlined_call_operand.vmem [shape: bf16[8,64], index: 8, kind: input, shape index: {}]   ;;  %s4505_s9 = inlined_call_operand.vmem [shape: bf16[24,8], index: 9, kind: input, shape index: {}]   ;;  %s4506_s10 = inlined_call_operand.vmem [shape: bf16[24,8], index: 10, kind: input, shape index: {}]   ;;  %s4507_s11 = inlined_call_operand.vmem [shape: f32[760,1], index: 11, kind: input, shape index: {}]   ;;  %s4508_s12 = inlined_call_operand.hbm [shape: f32[8,512], index: 12, kind: output, shape index: {}]  }
   0x1   :  { %4530 = sst [smem:[#allocation19_spill]] %s4496_s0 }
   0x2   :  { %4531 = sst [smem:[#allocation20_spill]] %s4497_s1 }
   0x3   :  { %17 = vsyncpa [#allocation4], 0 }
   0x4   :  { %19 = vsyncpa [#allocation4 + $0x1], 0  ;;  %s3328_s21 = smov 0   ;;  %s3330_s22 = smov 0  }
   0x5   :  { %s3332_s23 = smov 0   ;;  %s3334_s24 = smov 0  }
   0x6 LB: > { %s3349_s25 = sadd.s32 4294967295, %s3259_s24   ;;  %s2895_s26 = sadd.s32 4294967294, %s3259_s24   ;;  %s3259_s24 = sphi %s3334_s24, %s4580_s24   ;;  %s3255_s23 = sphi %s3332_s23, %s4579_s23   ;;  %s3251_s22 = sphi %s3330_s22, %s4578_s22   ;;  %s3247_s21 = sphi %s3328_s21, %s4577_s21  }
   0x7   : > { %s3353_s27 = sadd.s32 1, %s3259_s24   ;;  %s32_s28 = sadd.s32 1, %s3255_s23 }
   0x8   : > { %s29_s29 = ssub.s32 %s3259_s24, %s3353_s27  ;;  %p39_p0 = scmp.ne.s32.totalorder %s3255_s23, %s3251_s22 }
   0x9   : > { %p30_p1 = scmp.eq.s32.totalorder %s29_s29, 0  ;;  %p40_p2 = scmp.eq.s32.totalorder %s3259_s24, 0 }
   0xa   : > { %p310_p3 = scmp.eq.s32.totalorder %s3349_s25, 1  ;;  %p315_p4 = scmp.ne.s32.totalorder %s3251_s22, %s3247_s21 }
   0xb   : > { %s3365_s30 = scalar_select %p30_p1, %s3255_s23, %s32_s28  }
   0xc   : > { %p41_p5 = por %p40_p2, %p39_p0  ;;  %p3367_p6 = por %p310_p3, %p39_p0 }
   0xd   : > { %4532 = sst [smem:[#allocation6_spill]] %s3365_s30  ;;  %p316_p7 = scmp.eq.s32.totalorder %s2895_s26, 1 }
   0xe   : > { %p4529_p9 = scmp.ge.s32.totalorder %s3259_s24, 2 }
   0xf   : > { %p3371_p8 = por %p316_p7, %p315_p4 }
  0x10   : > { %359 = sbr.rel (%p4529_p9) target bundleno = 33 (0x21), region = 52 }
  0x15   : > { %362 = sbr.rel (!%p41_p5) target bundleno = 33 (0x21), region = 56  ;;  %s364_s15 = sand.u32 (%p41_p5), 1, %s3255_s23  }
  0x16   : > { %s3027_s16 = sshll.u32 (%p41_p5), %s3259_s24, 3  ;;  %s2898_s17 = sshll.u32 (%p41_p5), %s364_s15, 5 }
  0x17   : > { %s4535_s0 = sld [smem:[#allocation19_spill]] (%p41_p5)  ;;  %s366_s26 = scalar_lea.vmem (%p41_p5), [#allocation2], %s2898_s17 }
  0x1d   : > { %s369_s20 = scalar_lea.vmem %s4535_s0, %s3027_s16 }
  0x1e   : > { %v404_v0 = vld [vmem:[%s369_s20] sm:$0xff]  ;;  %v406_v1 = vld [vmem:[%s369_s20 + $0x10] sm:$0xff] }
  0x1f   : > { %v408_v2 = vld [vmem:[%s369_s20 + $0x20] sm:$0xff]  ;;  %405 = vst [vmem:[%s366_s26] sm:$0xff] %v404_v0  ;;  %407 = vst [vmem:[%s366_s26 + $0x8] sm:$0xff] %v406_v1  ;;  %v410_v3 = vld [vmem:[%s369_s20 + $0x30] sm:$0xff] }
  0x20   : > { %409 = vst [vmem:[%s366_s26 + $0x10] sm:$0xff] %v408_v2  ;;  %411 = vst [vmem:[%s366_s26 + $0x18] sm:$0xff] %v410_v3 }
  0x21 PF: > { %p2901_p10 = scmp.ge.s32.totalorder %s3259_s24, 1  ;;  %p434_p11 = scmp.lt.s32.totalorder %s3259_s24, 3 }
  0x23   : > { %p435_p12 = pnand %p2901_p10, %p434_p11 }
  0x25   : > { %438 = sbr.rel (%p435_p12) target bundleno = 1777 (0x6f1), region = 102 }
  0x2a   : > { %v557_v4 = vld [vmem:[%s4507_s11 + $0x70] sm:$0xff]  ;;  %v555_v5 = vld [vmem:[%s4507_s11 + $0x60] sm:$0xff]  ;;  %s3392_s17 = sand.u32 1, %s3251_s22   ;;  %v4509_v6 = vmov 0   ;;  %v558_v7 = vld [vmem:[%s4507_s11 + $0x78] sm:$0xff]  ;;  %vm835_vm0 = vcmask 261120  }
  0x2b   : > { %3070 = vset.pattern.permute.xlu1 %v4509_v6  ;;  %3069 = vset.pattern.permute.xlu0 %v4509_v6  ;;  %s2902_s18 = sshll.u32 %s3392_s17, 5  ;;  %v556_v8 = vld [vmem:[%s4507_s11 + $0x68] sm:$0xff]  ;;  %v554_v12 = vld [vmem:[%s4507_s11 + $0x58] sm:$0xff]  ;;  %v553_v13 = vld [vmem:[%s4507_s11 + $0x50] sm:$0xff]  ;;  %s4574_s1 = sld [smem:[#allocation20_spill]]  ;;  %vm2399_vm1 = vcmask 1043456  }
  0x2c   : > { %647 = vperm.xlu0 %3069, %v557_v4   ;;  %637 = vperm.xlu1 %3070, %v555_v5   ;;  %s443_s29 = scalar_lea.vmem [#allocation2], %s2902_s18  ;;  %v552_v15 = vld [vmem:[%s4507_s11 + $0x48] sm:$0xff]  ;;  %v551_v16 = vld [vmem:[%s4507_s11 + $0x40] sm:$0xff]  ;;  %v550_v18 = vld [vmem:[%s4507_s11 + $0x38] sm:$0xff]  ;;  %vm2386_vm2 = vcmask 64512   ;;  %vm2510_vm3 = vcmask 523264  }
  0x2d   : > { %v3071_v9 = vld [vmem:[%s443_s29 + $0x14] ss:$8 sps:$4 sm:$0xff]   ;;  %916 = vmatprep.mubr.bf16.mxu0 %v4509_v6  ;;  %v3073_v10 = vld [vmem:[%s443_s29 + $0x10] ss:$8 sps:$4 sm:$0xff]   ;;  %v3074_v11 = vld [vmem:[%s443_s29 + $0x4] ss:$8 sps:$4 sm:$0xff]  }
  0x2e   : > { %896 = vmatprep.subr.bf16.mxu0 %v3071_v9  ;;  %v3076_v14 = vld [vmem:[%s443_s29] ss:$8 sps:$4 sm:$0xff]   ;;  %v549_v19 = vld [vmem:[%s4507_s11 + $0x30] sm:$0xff]  ;;  %v546_v23 = vld [vmem:[%s4507_s11 + $0x18] sm:$0xff]  ;;  %s2904_s29 = sshll.u32 %s3349_s25, 1  ;;  %s3028_s28 = sshll.u32 %s3349_s25, 8 }
  0x2f   : > { %897 = vmatpush1.bf16.msra.mxu0 %v3073_v10  ;;  %v3077_v17 = vld [vmem:[%s4499_s3] sm:$0xff]   ;;  %v548_v20 = vld [vmem:[%s4507_s11 + $0x28] sm:$0xff]  ;;  %v545_v24 = vld [vmem:[%s4507_s11 + $0x10] sm:$0xff]  ;;  %p494_p13 = scmp.lt.s32.totalorder %s2904_s29, 3  ;;  %s3262_s25 = smov [#allocation3]  }
  0x30   : > { %652 = vperm.xlu0 %3069, %v558_v7   ;;  %642 = vperm.xlu1 %3070, %v556_v8   ;;  %v547_v21 = vld [vmem:[%s4507_s11 + $0x20] sm:$0xff]  ;;  %v3078_v22 = vld [vmem:[%s4499_s3 + $0x8] sm:$0xff]   ;;  %v3079_v27 = vld [vmem:[%s4499_s3 + $0x10] sm:$0xff]  }
  0x31   : > { %898 = vmatprep.subr.bf16.mxu0 %v3074_v11  ;;  %v544_v25 = vld [vmem:[%s4507_s11 + $0x8] sm:$0xff]  ;;  %v543_v26 = vld [vmem:[%s4507_s11] sm:$0xff]  ;;  %v574_v28 = vld [vmem:[%s4507_s11 + $0xf8] sm:$0xff]  ;;  %s4582_s29 = smov (!%p494_p13, %s2904_s29), 3 }
  0x32   : > { %v573_v29 = vld [vmem:[%s4507_s11 + $0xf0] sm:$0xff]  ;;  %v572_v30 = vld [vmem:[%s4507_s11 + $0xe8] sm:$0xff]  ;;  %v571_v31 = vld [vmem:[%s4507_s11 + $0xe0] sm:$0xff]  ;;  %s2905_s19 = sshll.u32 %s4582_s29, 2  ;;  %s2907_s18 = sshll.u32 %s4582_s29, 3 }
  0x33   : > { %899 = vmatpush1.bf16.msra.mxu0 %v3076_v14  ;;  %v3080_v32 = vld [vmem:[%s4499_s3 + $0x18] sm:$0xff]   ;;  %v569_v34 = vld [vmem:[%s4507_s11 + $0xd0] sm:$0xff]  ;;  %v568_v35 = vld [vmem:[%s4507_s11 + $0xc8] sm:$0xff]  ;;  %s497_s0 = scalar_lea.vmem %s4574_s1, %s2905_s19  ;;  %s503_s30 = scalar_lea.vmem %s4498_s2, %s2907_s18 }
  0x34   : > { %632 = vperm.xlu1 %3070, %v554_v12   ;;  %627 = vperm.xlu0 %3069, %v553_v13   ;;  %v570_v33 = vld [vmem:[%s4507_s11 + $0xd8] sm:$0xff]  ;;  %v567_v36 = vld [vmem:[%s4507_s11 + $0xc0] sm:$0xff]  ;;  %v565_v39 = vld [vmem:[%s4507_s11 + $0xb0] sm:$0xff]  ;;  %s2903_s29 = sshll.u32 %s3392_s17, 4  ;;  %s2804_s18 = scalar_lea.hbm %s4508_s12, %s3028_s28 }
  0x35   : > { %v3081_v37 = vld [vmem:[%s4499_s3 + $0x20] sm:$0xff]   ;;  %v566_v38 = vld [vmem:[%s4507_s11 + $0xb8] sm:$0xff]  ;;  %v564_v40 = vld [vmem:[%s4507_s11 + $0xa8] sm:$0xff]  ;;  %s491_s15 = scalar_lea.vmem [#allocation3], %s2903_s29 }
  0x36   : > { %2928 = vmatmul.mubr.msk.bf16.vlgmr.msra.gmra.mxu0 %vm835_vm0, %v3077_v17  ;;  %v563_v41 = vld [vmem:[%s4507_s11 + $0xa0] sm:$0xff]  ;;  %v3082_v42 = vld [vmem:[%s4499_s3 + $0x28] sm:$0xff]   ;;  %v562_v43 = vld [vmem:[%s4507_s11 + $0x98] sm:$0xff]  ;;  %s2806_s16 = sshll.u32 %s491_s15, 4  ;;  %s2807_s16 = int_to_ptr.vmem [resolvable:$true] %s2806_s16 }
  0x37   : > { %926 = vmatprep.mubr.bf16.mxu0 %v4509_v6  ;;  %v561_v44 = vld [vmem:[%s4507_s11 + $0x90] sm:$0xff]  ;;  %v560_v45 = vld [vmem:[%s4507_s11 + $0x88] sm:$0xff]  ;;  %v559_v46 = vld [vmem:[%s4507_s11 + $0x80] sm:$0xff]  ;;  %s3199_s26 = scalar_lea.vmem %s2807_s16, 256 }
  0x38   : > { %622 = vperm.xlu1 %3070, %v552_v15   ;;  %617 = vperm.xlu0 %3069, %v551_v16   ;;  %v3083_v47 = vld [vmem:[%s4499_s3 + $0x30] sm:$0xff]   ;;  %v1220_v48 = vld [vmem:[%s4507_s11 + $0x178] sm:$0xff]  ;;  %v1218_v50 = vld [vmem:[%s4507_s11 + $0x168] sm:$0xff]  ;;  %p3200_p0 = scmp.ne.s32.totalorder %s2807_s16, %s3199_s26 }
  0x39   : > { %v1219_v49 = vld [vmem:[%s4507_s11 + $0x170] sm:$0xff]  ;;  %v1217_v51 = vld [vmem:[%s4507_s11 + $0x160] sm:$0xff]  ;;  %v3084_v52 = vld [vmem:[%s4499_s3 + $0x38] sm:$0xff]  }
  0x3a   : > { %v1216_v53 = vld [vmem:[%s4507_s11 + $0x158] sm:$0xff]  ;;  %v1215_v54 = vld [vmem:[%s4507_s11 + $0x150] sm:$0xff]  ;;  %v1214_v55 = vld [vmem:[%s4507_s11 + $0x148] sm:$0xff]  ;;  %p3201_p1 = pnand %p3200_p0, %p3367_p6 }
  0x3b   : > { %v1213_v56 = vld [vmem:[%s4507_s11 + $0x140] sm:$0xff]  ;;  %v1212_v58 = vld [vmem:[%s4507_s11 + $0x138] sm:$0xff]  ;;  %v1211_v59 = vld [vmem:[%s4507_s11 + $0x130] sm:$0xff] }
  0x3c   : > { %612 = vperm.xlu1 %3070, %v550_v18   ;;  %607 = vperm.xlu0 %3069, %v549_v19   ;;  %v3085_v57 = vld [vmem:[%s4499_s3 + $0x40] sm:$0xff]   ;;  %v1210_v60 = vld [vmem:[%s4507_s11 + $0x128] sm:$0xff]  ;;  %v1208_v63 = vld [vmem:[%s4507_s11 + $0x118] sm:$0xff]  ;;  %p3202_p2 = pneg %p3201_p1 }
  0x3d   : > { %v1209_v61 = vld [vmem:[%s4507_s11 + $0x120] sm:$0xff]  ;;  %v3086_v62 = vld [vmem:[%s4499_s3 + $0x48] sm:$0xff]   ;;  %v1207_v0 = vld [vmem:[%s4507_s11 + $0x110] sm:$0xff] }
  0x3e   : > { %2929 = vmatmul.mubr.msk.bf16.gmra.mxu0 %vm835_vm0, %v3078_v22  ;;  %v1206_v1 = vld [vmem:[%s4507_s11 + $0x108] sm:$0xff]  ;;  %v1205_v2 = vld [vmem:[%s4507_s11 + $0x100] sm:$0xff]  ;;  %v3087_v3 = vld [vmem:[%s4499_s3 + $0x50] sm:$0xff]  }
  0x3f   : > { %936 = vmatprep.mubr.bf16.mxu0 %v4509_v6  ;;  %v1236_v4 = vld [vmem:[%s4507_s11 + $0x1f8] sm:$0xff]  ;;  %v1235_v5 = vld [vmem:[%s4507_s11 + $0x1f0] sm:$0xff]  ;;  %v1234_v7 = vld [vmem:[%s4507_s11 + $0x1e8] sm:$0xff] }
  0x40   : > { %602 = vperm.xlu1 %3070, %v548_v20   ;;  %597 = vperm.xlu0 %3069, %v547_v21   ;;  %v1233_v8 = vld [vmem:[%s4507_s11 + $0x1e0] sm:$0xff]  ;;  %v3088_v9 = vld [vmem:[%s4499_s3 + $0x58] sm:$0xff]   ;;  %v1231_v11 = vld [vmem:[%s4507_s11 + $0x1d0] sm:$0xff] }
  0x41   : > { %v1232_v10 = vld [vmem:[%s4507_s11 + $0x1d8] sm:$0xff]  ;;  %v1230_v12 = vld [vmem:[%s4507_s11 + $0x1c8] sm:$0xff]  ;;  %v1229_v13 = vld [vmem:[%s4507_s11 + $0x1c0] sm:$0xff] }
  0x42   : > { %v3089_v14 = vld [vmem:[%s4499_s3 + $0x60] sm:$0xff]   ;;  %v1228_v15 = vld [vmem:[%s4507_s11 + $0x1b8] sm:$0xff]  ;;  %v1227_v16 = vld [vmem:[%s4507_s11 + $0x1b0] sm:$0xff] }
  0x43   : > { %v1226_v17 = vld [vmem:[%s4507_s11 + $0x1a8] sm:$0xff]  ;;  %v1225_v18 = vld [vmem:[%s4507_s11 + $0x1a0] sm:$0xff]  ;;  %v1224_v20 = vld [vmem:[%s4507_s11 + $0x198] sm:$0xff] }
  0x44   : > { %592 = vperm.xlu1 %3070, %v546_v23   ;;  %587 = vperm.xlu0 %3069, %v545_v24   ;;  %v3090_v19 = vld [vmem:[%s4499_s3 + $0x68] sm:$0xff]   ;;  %v1223_v21 = vld [vmem:[%s4507_s11 + $0x190] sm:$0xff]  ;;  %v1221_v23 = vld [vmem:[%s4507_s11 + $0x180] sm:$0xff] }
  0x45   : > { %v1222_v22 = vld [vmem:[%s4507_s11 + $0x188] sm:$0xff]  ;;  %v3091_v24 = vld [vmem:[%s4499_s3 + $0x70] sm:$0xff]  }
  0x46   : > { %2930 = vmatmul.mubr.msk.bf16.gmra.mxu0 %vm835_vm0, %v3079_v27  ;;  %v1875_v27 = vld [vmem:[%s4507_s11 + $0x268] sm:$0xff] }
  0x47   : > { %946 = vmatprep.mubr.bf16.mxu0 %v4509_v6 }
  0x48   : > { %582 = vperm.xlu1 %3070, %v544_v25   ;;  %577 = vperm.xlu0 %3069, %v543_v26   ;;  %v1877_v25 = vld [vmem:[%s4507_s11 + $0x278] sm:$0xff]  ;;  %v1876_v26 = vld [vmem:[%s4507_s11 + $0x270] sm:$0xff] }
  0x4c   : > { %732 = vperm.xlu1 %3070, %v574_v28   ;;  %727 = vperm.xlu0 %3069, %v573_v29   ;;  %v1874_v28 = vld [vmem:[%s4507_s11 + $0x260] sm:$0xff]  ;;  %v3092_v29 = vld [vmem:[%s4499_s3 + $0x78] sm:$0xff]  }
  0x4e   : > { %2931 = vmatmul.mubr.msk.bf16.gmra.mxu0 %vm835_vm0, %v3080_v32  ;;  %v1871_v32 = vld [vmem:[%s4507_s11 + $0x248] sm:$0xff] }
  0x4f   : > { %956 = vmatprep.mubr.bf16.mxu0 %v4509_v6 }
  0x50   : > { %722 = vperm.xlu1 %3070, %v572_v30   ;;  %717 = vperm.xlu0 %3069, %v571_v31   ;;  %v1873_v30 = vld [vmem:[%s4507_s11 + $0x258] sm:$0xff]  ;;  %v1872_v31 = vld [vmem:[%s4507_s11 + $0x250] sm:$0xff] }
  0x54   : > { %712 = vperm.xlu1 %3070, %v570_v33   ;;  %707 = vperm.xlu0 %3069, %v569_v34   ;;  %v1870_v33 = vld [vmem:[%s4507_s11 + $0x240] sm:$0xff]  ;;  %v1869_v34 = vld [vmem:[%s4507_s11 + $0x238] sm:$0xff] }
  0x56   : > { %2932 = vmatmul.mubr.msk.bf16.gmra.mxu0 %vm835_vm0, %v3081_v37  ;;  %v1866_v37 = vld [vmem:[%s4507_s11 + $0x220] sm:$0xff] }
  0x57   : > { %966 = vmatprep.mubr.bf16.mxu0 %v4509_v6 }
  0x58   : > { %702 = vperm.xlu1 %3070, %v568_v35   ;;  %697 = vperm.xlu0 %3069, %v567_v36   ;;  %v1868_v35 = vld [vmem:[%s4507_s11 + $0x230] sm:$0xff]  ;;  %v1867_v36 = vld [vmem:[%s4507_s11 + $0x228] sm:$0xff] }
  0x5c   : > { %692 = vperm.xlu1 %3070, %v566_v38   ;;  %687 = vperm.xlu0 %3069, %v565_v39   ;;  %v1865_v38 = vld [vmem:[%s4507_s11 + $0x218] sm:$0xff]  ;;  %v1864_v39 = vld [vmem:[%s4507_s11 + $0x210] sm:$0xff] }
  0x5e   : > { %2933 = vmatmul.mubr.msk.bf16.gmra.mxu0 %vm835_vm0, %v3082_v42  ;;  %v2214_v42 = vld [vmem:[%s4507_s11 + $0x2b8] sm:$0xff] }
  0x5f   : > { %976 = vmatprep.mubr.bf16.mxu0 %v4509_v6 }
  0x60   : > { %682 = vperm.xlu1 %3070, %v564_v40   ;;  %677 = vperm.xlu0 %3069, %v563_v41   ;;  %v1863_v40 = vld [vmem:[%s4507_s11 + $0x208] sm:$0xff]  ;;  %v1862_v41 = vld [vmem:[%s4507_s11 + $0x200] sm:$0xff] }
  0x64   : > { %672 = vperm.xlu1 %3070, %v562_v43   ;;  %667 = vperm.xlu0 %3069, %v561_v44   ;;  %v2213_v43 = vld [vmem:[%s4507_s11 + $0x2b0] sm:$0xff]  ;;  %v2212_v44 = vld [vmem:[%s4507_s11 + $0x2a8] sm:$0xff] }
  0x66   : > { %2934 = vmatmul.mubr.msk.bf16.gmra.mxu0 %vm835_vm0, %v3083_v47  ;;  %v2210_v47 = vld [vmem:[%s4507_s11 + $0x298] sm:$0xff] }
  0x67   : > { %986 = vmatprep.mubr.bf16.mxu0 %v4509_v6 }
  0x68   : > { %662 = vperm.xlu1 %3070, %v560_v45   ;;  %657 = vperm.xlu0 %3069, %v559_v46   ;;  %v2211_v45 = vld [vmem:[%s4507_s11 + $0x2a0] sm:$0xff] }
  0x6c   : > { %1314 = vperm.xlu1 %3070, %v1220_v48   ;;  %1309 = vperm.xlu0 %3069, %v1219_v49   ;;  %v2209_v48 = vld [vmem:[%s4507_s11 + $0x290] sm:$0xff] }
  0x6e   : > { %2935 = vmatmul.mubr.msk.bf16.gmra.mxu0 %vm835_vm0, %v3084_v52 }
  0x6f   : > { %996 = vmatprep.mubr.bf16.mxu0 %v4509_v6 }
  0x70   : > { %1304 = vperm.xlu1 %3070, %v1218_v50   ;;  %1299 = vperm.xlu0 %3069, %v1217_v51   ;;  %v2208_v50 = vld [vmem:[%s4507_s11 + $0x288] sm:$0xff]  ;;  %v2207_v51 = vld [vmem:[%s4507_s11 + $0x280] sm:$0xff] }
  0x74   : > { %1294 = vperm.xlu1 %3070, %v1216_v53   ;;  %1289 = vperm.xlu0 %3069, %v1215_v54   ;;  %v2564_v54 = vld [vmem:[%s4507_s11 + $0x2c8] sm:$0xff] }
  0x76   : > { %2936 = vmatmul.mubr.msk.bf16.gmra.mxu0 %vm835_vm0, %v3085_v57  ;;  %v2565_v57 = vld [vmem:[%s4507_s11 + $0x2d0] sm:$0xff] }
  0x77   : > { %1006 = vmatprep.mubr.bf16.mxu0 %v4509_v6 }
  0x78   : > { %1284 = vperm.xlu1 %3070, %v1214_v55   ;;  %1279 = vperm.xlu0 %3069, %v1213_v56   ;;  %v2504_v55 = vld [vmem:[%s4507_s11 + $0x2c0] sm:$0xff] }
  0x7c   : > { %1274 = vperm.xlu1 %3070, %v1212_v58   ;;  %1269 = vperm.xlu0 %3069, %v1211_v59   ;;  %v2658_v58 = vld [vmem:[%s4507_s11 + $0x2e0] sm:$0xff] }
  0x7e   : > { %2937 = vmatmul.mubr.msk.bf16.gmra.mxu0 %vm835_vm0, %v3086_v62 }
  0x7f   : > { %1016 = vmatprep.mubr.bf16.mxu0 %v4509_v6 }
  0x80   : > { %1264 = vperm.xlu1 %3070, %v1210_v60   ;;  %1259 = vperm.xlu0 %3069, %v1209_v61   ;;  %v2660_v60 = vld [vmem:[%s4507_s11 + $0x2f0] sm:$0xff]  ;;  %v2659_v61 = vld [vmem:[%s4507_s11 + $0x2e8] sm:$0xff] }
  0x84   : > { %1254 = vperm.xlu1 %3070, %v1208_v63   ;;  %1249 = vperm.xlu0 %3069, %v1207_v0   ;;  %v2566_v0 = vld [vmem:[%s4507_s11 + $0x2d8] sm:$0xff] }
  0x86   : > { %2938 = vmatmul.mubr.msk.bf16.gmra.mxu0 %vm835_vm0, %v3087_v3 }
  0x87   : > { %1026 = vmatprep.mubr.bf16.mxu0 %v4509_v6 }
  0x88   : > { %1244 = vperm.xlu1 %3070, %v1206_v1   ;;  %1239 = vperm.xlu0 %3069, %v1205_v2  }
  0x8c   : > { %1394 = vperm.xlu1 %3070, %v1236_v4   ;;  %1389 = vperm.xlu0 %3069, %v1235_v5  }
  0x8e   : > { %2939 = vmatmul.mubr.msk.bf16.gmra.mxu0 %vm835_vm0, %v3088_v9 }
  0x8f   : > { %1036 = vmatprep.mubr.bf16.mxu0 %v4509_v6 }
  0x90   : > { %1384 = vperm.xlu1 %3070, %v1234_v7   ;;  %1379 = vperm.xlu0 %3069, %v1233_v8  }
  0x94   : > { %1374 = vperm.xlu1 %3070, %v1232_v10   ;;  %1369 = vperm.xlu0 %3069, %v1231_v11  }
  0x96   : > { %2940 = vmatmul.mubr.msk.bf16.gmra.mxu0 %vm835_vm0, %v3089_v14 }
  0x97   : > { %1046 = vmatprep.mubr.bf16.mxu0 %v4509_v6 }
  0x98   : > { %1364 = vperm.xlu1 %3070, %v1230_v12   ;;  %1359 = vperm.xlu0 %3069, %v1229_v13  }
  0x9c   : > { %1354 = vperm.xlu1 %3070, %v1228_v15   ;;  %1349 = vperm.xlu0 %3069, %v1227_v16  }
  0x9e   : > { %2941 = vmatmul.mubr.msk.bf16.gmra.mxu0 %vm835_vm0, %v3090_v19 }
  0x9f   : > { %1056 = vmatprep.mubr.bf16.mxu0 %v4509_v6 }
  0xa0   : > { %1344 = vperm.xlu1 %3070, %v1226_v17   ;;  %1339 = vperm.xlu0 %3069, %v1225_v18  }
  0xa4   : > { %1334 = vperm.xlu1 %3070, %v1224_v20   ;;  %1329 = vperm.xlu0 %3069, %v1223_v21  }
  0xa6   : > { %2942 = vmatmul.mubr.msk.bf16.gmra.mxu0 %vm835_vm0, %v3091_v24 }
  0xa7   : > { %1066 = vmatprep.mubr.bf16.mxu0 %v4509_v6  ;;  %v3723_v46 = vpop.permute.xlu0 %647  ;;  %v3731_v49 = vpop.permute.xlu1 %637 }
  0xa8   : > { %1324 = vperm.xlu1 %3070, %v1222_v22   ;;  %1319 = vperm.xlu0 %3069, %v1221_v23  }
  0xab   : > { %v3739_v52 = vpop.permute.xlu0 %652  ;;  %v3741_v53 = vpop.permute.xlu1 %642 }
  0xac   : > { %1955 = vperm.xlu1 %3070, %v1877_v25   ;;  %1950 = vperm.xlu0 %3069, %v1876_v26  }
  0xae   : > { %2943 = vmatmul.mubr.msk.bf16.gmra.mxu0 %vm835_vm0, %v3092_v29 }
  0xaf   : > { %v3749_v56 = vpop.permute.xlu0 %627  ;;  %v3757_v59 = vpop.permute.xlu1 %632 }
  0xb0   : > { %1945 = vperm.xlu1 %3070, %v1875_v27   ;;  %1940 = vperm.xlu0 %3069, %v1874_v28  }
  0xb3   : > { %v3765_v62 = vpop.permute.xlu0 %617  ;;  %v3767_v63 = vpop.permute.xlu1 %622 }
  0xb4   : > { %1935 = vperm.xlu1 %3070, %v1873_v30   ;;  %1930 = vperm.xlu0 %3069, %v1872_v31  }
  0xb7   : > { %v3772_v1 = vpop.permute.xlu0 %607  ;;  %v3774_v2 = vpop.permute.xlu1 %612 }
  0xb8   : > { %1925 = vperm.xlu1 %3070, %v1871_v32   ;;  %1920 = vperm.xlu0 %3069, %v1870_v33  }
  0xbb   : > { %v3776_v3 = vpop.permute.xlu0 %597  ;;  %v3778_v4 = vpop.permute.xlu1 %602 }
  0xbc   : > { %1915 = vperm.xlu1 %3070, %v1869_v34   ;;  %1910 = vperm.xlu0 %3069, %v1868_v35  }
  0xbf   : > { %v3780_v5 = vpop.permute.xlu0 %587  ;;  %v3782_v7 = vpop.permute.xlu1 %592 }
  0xc0   : > { %1905 = vperm.xlu1 %3070, %v1867_v36   ;;  %1900 = vperm.xlu0 %3069, %v1866_v37  }
  0xc3   : > { %v3784_v9 = vpop.permute.xlu0 %577  ;;  %v3789_v12 = vpop.permute.xlu1 %582 }
  0xc4   : > { %1895 = vperm.xlu1 %3070, %v1865_v38   ;;  %1890 = vperm.xlu0 %3069, %v1864_v39  }
  0xc7   : > { %v3812_v32 = vpop.permute.xlu0 %727  ;;  %v3816_v34 = vpop.permute.xlu1 %732 }
  0xc8   : > { %1885 = vperm.xlu1 %3070, %v1863_v40   ;;  %1880 = vperm.xlu0 %3069, %v1862_v41   ;;  %4536 = vst [vmem:[#allocation7_spill] sm:$0xff] %v3812_v32  ;;  %4537 = vst [vmem:[#allocation8_spill] sm:$0xff] %v3816_v34 }
  0xcb   : > { %v3822_v37 = vpop.permute.xlu0 %717  ;;  %v3824_v39 = vpop.permute.xlu1 %722 }
  0xcc   : > { %2252 = vperm.xlu1 %3070, %v2214_v42   ;;  %2247 = vperm.xlu0 %3069, %v2213_v43   ;;  %4538 = vst [vmem:[#allocation9_spill] sm:$0xff] %v3822_v37  ;;  %4539 = vst [vmem:[#allocation10_spill] sm:$0xff] %v3824_v39  ;;  %v3095_v42 = vld [vmem:[%s4500_s4 + $0x4] ss:$8 sps:$4 sm:$0xff]  }
  0xcd   : > { %1589 = vmatprep.mubr.bf16.mxu1 %v3095_v42 }
  0xcf   : > { %v3831_v43 = vpop.permute.xlu0 %707 }
  0xd0   : > { %2242 = vperm.xlu1 %3070, %v2212_v44   ;;  %2237 = vperm.xlu0 %3069, %v2211_v45   ;;  %4540 = vst [vmem:[#allocation11_spill] sm:$0xff] %v3831_v43  ;;  %v3835_v45 = vpop.permute.xlu1 %712 }
  0xd1   : > { %4541 = vst [vmem:[#allocation12_spill] sm:$0xff] %v3835_v45 }
  0xd4   : > { %2232 = vperm.xlu1 %3070, %v2210_v47   ;;  %2227 = vperm.xlu0 %3069, %v2209_v48  }
  0xd8   : > { %2222 = vperm.xlu1 %3070, %v2208_v50   ;;  %2217 = vperm.xlu0 %3069, %v2207_v51   ;;  %v3837_v50 = vpop.permute.xlu0 %697 }
  0xd9   : > { %4542 = vst [vmem:[#allocation13_spill] sm:$0xff] %v3837_v50 }
  0xdc   : > { %2569 = vperm.xlu1 %3070, %v2564_v54   ;;  %2507 = vperm.xlu0 %3069, %v2504_v55   ;;  %v3839_v54 = vpop.permute.xlu1 %702 }
  0xdd   : > { %4543 = vst [vmem:[#allocation14_spill] sm:$0xff] %v3839_v54 }
  0xe0   : > { %2574 = vperm.xlu1 %3070, %v2565_v57   ;;  %2663 = vperm.xlu0 %3069, %v2658_v58   ;;  %v3841_v58 = vpop.permute.xlu0 %687 }
  0xe1   : > { %4544 = vst [vmem:[#allocation15_spill] sm:$0xff] %v3841_v58 }
  0xe4   : > { %2673 = vperm.xlu1 %3070, %v2660_v60   ;;  %2668 = vperm.xlu0 %3069, %v2659_v61   ;;  %v3843_v61 = vpop.permute.xlu1 %692 }
  0xe5   : > { %4545 = vst [vmem:[#allocation16_spill] sm:$0xff] %v3843_v61 }
  0xe8   : > { %2579 = vperm.xlu0 %3069, %v2566_v0  }
  0xf6   : > { %v918_v8 = vpop.f32.mrf.mxu0 }
  0xf7   : > { %v919_v11 = vadd.f32 %v918_v8, %v3784_v9 }
  0xf8   : > { %v3786_v10 = vpop.f32.mrf.mxu0 }
  0xf9   : > { %v1077_v16 = vmax.f32 %v919_v11, 0.0  ;;  %v3845_v11 = vpop.permute.xlu0 %677 }
  0xfa   : > { %v922_v13 = vpop.f32.mrf.mxu0  ;;  %4546 = vst [vmem:[#allocation17_spill] sm:$0xff] %v3845_v11 }
  0xfb   : > { %v923_v14 = vadd.f32 %v922_v13, %v3789_v12 }
  0xfc   : > { %v3792_v15 = vpop.f32.mrf.mxu0 }
  0xfd   : > { %v1079_v17 = vmax.f32 %v923_v14, 0.0  ;;  %v3847_v14 = vpop.permute.xlu1 %682 }
  0xfe   : > { %v928_v18 = vpop.f32.mrf.mxu0  ;;  %4547 = vst [vmem:[#allocation18_spill] sm:$0xff] %v3847_v14 }
  0xff   : > { %v3794_v19 = vpack.c.bf16 %v1079_v17, %v1077_v16  ;;  %v929_v21 = vadd.f32 %v928_v18, %v3780_v5  ;;  %v3849_v18 = vpop.permute.xlu0 %667 }
 0x100   : > { %v3796_v20 = vpop.f32.mrf.mxu0 }
 0x101   : > { %v1081_v25 = vmax.f32 %v929_v21, 0.0 }
 0x102   : > { %v932_v22 = vpop.f32.mrf.mxu0 }
 0x103   : > { %v933_v23 = vadd.f32 %v932_v22, %v3782_v7  ;;  %v658_v45 = vpop.permute.xlu0 %657 }
 0x104   : > { %v3800_v24 = vpop.f32.mrf.mxu0 }
 0x105   : > { %v1083_v26 = vmax.f32 %v933_v23, 0.0 }
 0x106   : > { %v3802_v27 = vpop.f32.mrf.mxu0 }
 0x107   : > { %v3804_v28 = vpack.c.bf16 %v1083_v26, %v1081_v25  ;;  %v3854_v26 = vpop.permute.xlu1 %672 }
 0x108   : > { %v3806_v29 = vpop.f32.mrf.mxu0 }
 0x10a   : > { %v3808_v30 = vpop.f32.mrf.mxu0 }
 0x10c   : > { %v3810_v31 = vpop.f32.mrf.mxu0 }
 0x10e   : > { %v3814_v33 = vpop.f32.mrf.mxu0 }
 0x110   : > { %v3818_v35 = vpop.f32.mrf.mxu0 }
 0x112   : > { %v3820_v36 = vpop.f32.mrf.mxu0 }
 0x114   : > { %v954_v38 = vpop.f32.mrf.mxu0 }
 0x116   : > { %v3826_v40 = vpop.f32.mrf.mxu0 }
 0x118   : > { %v960_v41 = vpop.f32.mrf.mxu0 }
 0x11a   : > { %v3833_v44 = vpop.f32.mrf.mxu0 }
 0x11c   : > { %v964_v47 = vpop.f32.mrf.mxu0 }
 0x11e   : > { %v968_v48 = vpop.f32.mrf.mxu0 }
 0x120   : > { %v970_v51 = vpop.f32.mrf.mxu0 }
 0x122   : > { %v972_v55 = vpop.f32.mrf.mxu0 }
 0x124   : > { %v974_v57 = vpop.f32.mrf.mxu0 }
 0x125   : > { %v975_v54 = vadd.f32 %v974_v57, %v3757_v59 }
 0x126   : > { %v978_v60 = vpop.f32.mrf.mxu0 }
 0x128   : > { %v980_v0 = vpop.f32.mrf.mxu0 }
 0x129   : > { %v981_v11 = vadd.f32 %v980_v0, %v3731_v49 }
 0x12a   : > { %v982_v8 = vpop.f32.mrf.mxu0 }
 0x12b   : > { %v983_v58 = vadd.f32 %v982_v8, %v3741_v53 }
 0x12c   : > { %v984_v13 = vpop.f32.mrf.mxu0 }
 0x12d   : > { %v985_v22 = vadd.f32 %v984_v13, %v3741_v53  ;;  %v973_v53 = vadd.f32 %v972_v55, %v3757_v59  ;;  %v1103_v8 = vmax.f32 %v983_v58, 0.0 }
 0x12e   : > { %v988_v16 = vpop.f32.mrf.mxu0 }
 0x12f   : > { %v989_v42 = vadd.f32 %v988_v16, %v3723_v46  ;;  %v1104_v13 = vmax.f32 %v985_v22, 0.0  ;;  %v1102_v16 = vmax.f32 %v981_v11, 0.0 }
 0x130   : > { %v990_v17 = vpop.f32.mrf.mxu0 }
 0x131   : > { %v991_v23 = vadd.f32 %v990_v17, %v3723_v46  ;;  %v1105_v37 = vmax.f32 %v989_v42, 0.0  ;;  %v971_v46 = vadd.f32 %v970_v51, %v3749_v56  ;;  %v961_v51 = vadd.f32 %v960_v41, %v3765_v62 }
 0x132   : > { %v992_v21 = vpop.f32.mrf.mxu0 }
 0x133   : > { %v993_v25 = vadd.f32 %v992_v21, %v3739_v52  ;;  %v1106_v43 = vmax.f32 %v991_v23, 0.0  ;;  %v979_v21 = vadd.f32 %v978_v60, %v3731_v49  ;;  %v1100_v23 = vmax.f32 %v975_v54, 0.0 }
 0x134   : > { %v994_v6 = vpop.f32.mrf.mxu0  ;;  %v955_v49 = vadd.f32 %v954_v38, %v3774_v2 }
 0x135   : > { %v995_v14 = vadd.f32 %v994_v6, %v3739_v52  ;;  %v1107_v61 = vmax.f32 %v993_v25, 0.0  ;;  %v663_v6 = vpop.permute.xlu1 %662  ;;  %v965_v52 = vadd.f32 %v964_v47, %v3767_v63  ;;  %v1098_v47 = vmax.f32 %v971_v46, 0.0 }
 0x136   : > { %v998_v50 = vpop.f32.mrf.mxu0 }
 0x137   : > { %v1108_v17 = vmax.f32 %v995_v14, 0.0  ;;  %v999_v0 = vadd.f32 %v998_v50, %v658_v45  ;;  %v1155_v22 = vpack.c.bf16 %v1107_v61, %v1105_v37  ;;  %v1154_v14 = vpack.c.bf16 %v1104_v13, %v1102_v16 }
 0x138   : > { %v1000_v34 = vpop.f32.mrf.mxu0  ;;  %v969_v50 = vadd.f32 %v968_v48, %v3749_v56  ;;  %v963_v37 = vadd.f32 %v3833_v44, %v3767_v63  ;;  %v1152_v38 = vpack.c.bf16 %v1100_v23, %v1098_v47  ;;  %v959_v48 = vadd.f32 %v3826_v40, %v3765_v62 }
 0x139   : > { %v1156_v32 = vpack.c.bf16 %v1108_v17, %v1106_v43  ;;  %v1001_v25 = vadd.f32 %v1000_v34, %v658_v45  ;;  %v1101_v43 = vmax.f32 %v979_v21, 0.0  ;;  %v1109_v11 = vmax.f32 %v999_v0, 0.0 }
 0x13a   : > { %v1002_v57 = vpop.f32.mrf.mxu0  ;;  %v1096_v34 = vmax.f32 %v965_v52, 0.0  ;;  %v1099_v45 = vmax.f32 %v973_v53, 0.0  ;;  %v1097_v61 = vmax.f32 %v969_v50, 0.0  ;;  %v1094_v13 = vmax.f32 %v961_v51, 0.0 }
 0x13b   : > { %v1003_v39 = vadd.f32 %v1002_v57, %v663_v6  ;;  %1557 = vmatprep.subr.bf16.mxu1 %v1156_v32  ;;  %v1153_v32 = vpack.c.bf16 %v1103_v8, %v1101_v43  ;;  %v1110_v58 = vmax.f32 %v1001_v25, 0.0  ;;  %v945_v17 = vadd.f32 %v3810_v31, %v3778_v4 }
 0x13c   : > { %v1004_v60 = vpop.f32.mrf.mxu0  ;;  %1558 = vmatpush1.bf16.msra.mxu1 %v1155_v22  ;;  %v953_v21 = vadd.f32 %v3820_v36, %v3774_v2  ;;  %v1095_v46 = vmax.f32 %v963_v37, 0.0  ;;  %v1151_v62 = vpack.c.bf16 %v1099_v45, %v1097_v61  ;;  %v1092_v16 = vmax.f32 %v955_v49, 0.0 }
 0x13d   : > { %v1111_v59 = vmax.f32 %v1003_v39, 0.0  ;;  %v1005_v55 = vadd.f32 %v1004_v60, %v663_v6  ;;  %1559 = vmatprep.subr.bf16.mxu1 %v1154_v14  ;;  %v951_v39 = vadd.f32 %v3818_v35, %v3772_v1  ;;  %v1150_v0 = vpack.c.bf16 %v1096_v34, %v1094_v13 }
 0x13e   : > { %v1008_v54 = vpop.f32.mrf.mxu0  ;;  %v935_v52 = vadd.f32 %v3800_v24, %v3782_v7  ;;  %v941_v53 = vadd.f32 %v3806_v29, %v3776_v3  ;;  %v949_v31 = vadd.f32 %v3814_v33, %v3772_v1  ;;  %v1093_v8 = vmax.f32 %v959_v48, 0.0 }
 0x13f   : > { %v3870_v41 = vpack.c.bf16 %v1111_v59, %v1109_v11  ;;  %v1112_v56 = vmax.f32 %v1005_v55, 0.0  ;;  %v1009_v44 = vadd.f32 %v1008_v54, %v3849_v18  ;;  %v1090_v36 = vmax.f32 %v951_v39, 0.0 }
 0x140   : > { %v1010_v42 = vpop.f32.mrf.mxu0  ;;  %1560 = vmatpush1.bf16.msra.mxu1 %v1153_v32  ;;  %v1088_v14 = vmax.f32 %v945_v17, 0.0  ;;  %v1091_v7 = vmax.f32 %v953_v21, 0.0  ;;  %v1149_v24 = vpack.c.bf16 %v1095_v46, %v1093_v8  ;;  %v939_v51 = vadd.f32 %v3802_v27, %v3776_v3 }
 0x141   : > { %v3876_v63 = vpack.c.bf16 %v1112_v56, %v1110_v58  ;;  %1561 = vmatprep.subr.bf16.mxu1 %v1152_v38  ;;  %v1011_v6 = vadd.f32 %v1010_v42, %v3849_v18  ;;  %v1113_v57 = vmax.f32 %v1009_v44, 0.0  ;;  %v943_v18 = vadd.f32 %v3808_v30, %v3778_v4 }
 0x142   : > { %v1012_v40 = vpop.f32.mrf.mxu0  ;;  %v1148_v29 = vpack.c.bf16 %v1092_v16, %v1090_v36  ;;  %v1089_v50 = vmax.f32 %v949_v31, 0.0  ;;  %v931_v4 = vadd.f32 %v3796_v20, %v3780_v5  ;;  %v1086_v30 = vmax.f32 %v941_v53, 0.0  ;;  %v4550_v53 = vld [vmem:[#allocation8_spill] sm:$0xff] }
 0x143   : > { %v1013_v35 = vadd.f32 %v1012_v40, %v3854_v26  ;;  %v1114_v49 = vmax.f32 %v1011_v6, 0.0  ;;  %v1087_v60 = vmax.f32 %v943_v18, 0.0  ;;  %v925_v59 = vadd.f32 %v3792_v15, %v3789_v12  ;;  %v4548_v6 = vld [vmem:[#allocation10_spill] sm:$0xff]  ;;  %v4552_v18 = vld [vmem:[#allocation12_spill] sm:$0xff] }
 0x144   : > { %v1014_v2 = vpop.f32.mrf.mxu0  ;;  %1562 = vmatpush1.bf16.msra.mxu1 %v1151_v62  ;;  %v1147_v47 = vpack.c.bf16 %v1091_v7, %v1089_v50  ;;  %v1084_v55 = vmax.f32 %v935_v52, 0.0  ;;  %v1146_v3 = vpack.c.bf16 %v1088_v14, %v1086_v30  ;;  %v1085_v27 = vmax.f32 %v939_v51, 0.0  ;;  %v4553_v51 = vld [vmem:[#allocation11_spill] sm:$0xff] }
 0x145   : > { %v1115_v22 = vmax.f32 %v1013_v35, 0.0  ;;  %v1015_v23 = vadd.f32 %v1014_v2, %v3854_v26  ;;  %1563 = vmatprep.subr.bf16.mxu1 %v1150_v0  ;;  %v921_v5 = vadd.f32 %v3786_v10, %v3784_v9  ;;  %v1082_v20 = vmax.f32 %v931_v4, 0.0  ;;  %v4549_v35 = vld [vmem:[#allocation7_spill] sm:$0xff]  ;;  %v4551_v2 = vld [vmem:[#allocation9_spill] sm:$0xff] }
 0x146   : > { %v3894_v25 = vpop.f32.mrf.mxu0  ;;  %v1145_v34 = vpack.c.bf16 %v1087_v60, %v1085_v27  ;;  %v1080_v32 = vmax.f32 %v925_v59, 0.0 }
 0x147   : > { %v3896_v1 = vpack.c.bf16 %v1115_v22, %v1113_v57  ;;  %v1116_v33 = vmax.f32 %v1015_v23, 0.0  ;;  %v1144_v54 = vpack.c.bf16 %v1084_v55, %v1082_v20  ;;  %v1078_v12 = vmax.f32 %v921_v5, 0.0  ;;  %v4554_v55 = vld [vmem:[#allocation14_spill] sm:$0xff] }
 0x148   : > { %v3900_v43 = vpop.f32.mrf.mxu0  ;;  %1564 = vmatpush1.bf16.msra.mxu1 %v1149_v24 }
 0x149   : > { %v3904_v26 = vpack.c.bf16 %v1116_v33, %v1114_v49  ;;  %1565 = vmatprep.subr.bf16.mxu1 %v1148_v29  ;;  %v1142_v58 = vpack.c.bf16 %v1080_v32, %v1078_v12  ;;  %v4555_v32 = vld [vmem:[#allocation13_spill] sm:$0xff] }
 0x14a   : > { %v3906_v11 = vpop.f32.mrf.mxu0 }
 0x14c   : > { %v3910_v37 = vpop.f32.mrf.mxu0  ;;  %1566 = vmatpush1.bf16.msra.mxu1 %v1147_v47 }
 0x14d   : > { %1567 = vmatprep.subr.bf16.mxu1 %v1146_v3 }
 0x14e   : > { %v3914_v45 = vpop.f32.mrf.mxu0 }
 0x150   : > { %v3916_v38 = vpop.f32.mrf.mxu0  ;;  %1568 = vmatpush1.bf16.msra.mxu1 %v1145_v34 }
 0x151   : > { %1569 = vmatprep.subr.bf16.mxu1 %v1144_v54 }
 0x152   : > { %v3918_v15 = vpop.f32.mrf.mxu0 }
 0x154   : > { %v1034_v56 = vpop.f32.mrf.mxu0  ;;  %1570 = vmatpush1.bf16.msra.mxu1 %v3804_v28 }
 0x155   : > { %1571 = vmatprep.subr.bf16.mxu1 %v1142_v58 }
 0x156   : > { %v1038_v9 = vpop.f32.mrf.mxu0 }
 0x158   : > { %v1040_v10 = vpop.f32.mrf.mxu0  ;;  %1572 = vmatpush1.bf16.msra.mxu1 %v3794_v19 }
 0x159   : > { %v1041_v54 = vadd.f32 %v1040_v10, %v4555_v32 }
 0x15a   : > { %v1042_v48 = vpop.f32.mrf.mxu0 }
 0x15b   : > { %v1043_v58 = vadd.f32 %v1042_v48, %v4554_v55 }
 0x15c   : > { %v1044_v61 = vpop.f32.mrf.mxu0 }
 0x15d   : > { %v1045_v3 = vadd.f32 %v1044_v61, %v4554_v55  ;;  %v1039_v61 = vadd.f32 %v1038_v9, %v4555_v32  ;;  %v3122_v55 = vld [vmem:[%s4500_s4 + $0x90] ss:$8 sps:$4 sm:$0xff]   ;;  %v3131_v32 = vld [vmem:[%s4500_s4 + $0xc0] ss:$8 sps:$4 sm:$0xff]  }
 0x15e   : > { %v1048_v42 = vpop.f32.mrf.mxu0 }
 0x15f   : > { %v1049_v20 = vadd.f32 %v1048_v42, %v4553_v51 }
 0x160   : > { %v1050_v39 = vpop.f32.mrf.mxu0 }
 0x161   : > { %v1051_v50 = vadd.f32 %v1050_v39, %v4553_v51  ;;  %v3111_v51 = vld [vmem:[%s4500_s4 + $0x64] ss:$8 sps:$4 sm:$0xff]  }
 0x162   : > { %v1052_v13 = vpop.f32.mrf.mxu0 }
 0x163   : > { %v1053_v60 = vadd.f32 %v1052_v13, %v4552_v18  ;;  %v1130_v12 = vmax.f32 %v1051_v50, 0.0  ;;  %v4556_v13 = vld [vmem:[#allocation16_spill] sm:$0xff] }
 0x164   : > { %v1054_v44 = vpop.f32.mrf.mxu0  ;;  %v1033_v10 = vadd.f32 %v3918_v15, %v4556_v13  ;;  %v3113_v50 = vld [vmem:[%s4500_s4 + $0x60] ss:$8 sps:$4 sm:$0xff]  }
 0x165   : > { %v1055_v14 = vadd.f32 %v1054_v44, %v4552_v18  ;;  %v1131_v39 = vmax.f32 %v1053_v60, 0.0  ;;  %v3117_v60 = vld [vmem:[%s4500_s4 + $0x84] ss:$8 sps:$4 sm:$0xff]  }
 0x166   : > { %v1058_v17 = vpop.f32.mrf.mxu0 }
 0x167   : > { %v1059_v49 = vadd.f32 %v1058_v17, %v4551_v2  ;;  %v1132_v27 = vmax.f32 %v1055_v14, 0.0  ;;  %v1035_v17 = vadd.f32 %v1034_v56, %v4556_v13  ;;  %v3140_v13 = vld [vmem:[%s4500_s4 + $0xf0] ss:$8 sps:$4 sm:$0xff]  }
 0x168   : > { %v1060_v21 = vpop.f32.mrf.mxu0 }
 0x169   : > { %v1061_v36 = vadd.f32 %v1060_v21, %v4551_v2  ;;  %v1133_v34 = vmax.f32 %v1059_v49, 0.0  ;;  %v1128_v21 = vmax.f32 %v1045_v3, 0.0  ;;  %v1124_v56 = vmax.f32 %v1035_v17, 0.0  ;;  %v3108_v49 = vld [vmem:[%s4500_s4 + $0x54] ss:$8 sps:$4 sm:$0xff]  }
 0x16a   : > { %v1062_v46 = vpop.f32.mrf.mxu0  ;;  %v3123_v3 = vld [vmem:[%s4500_s4 + $0xa4] ss:$8 sps:$4 sm:$0xff]   ;;  %v4560_v17 = vmov 0  }
 0x16b   : > { %v1063_v22 = vadd.f32 %v1062_v46, %v4548_v6  ;;  %v1134_v4 = vmax.f32 %v1061_v36, 0.0  ;;  %v1168_v46 = vpack.c.bf16 %v1132_v27, %v1130_v12  ;;  %v3125_v27 = vld [vmem:[%s4500_s4 + $0xa0] ss:$8 sps:$4 sm:$0xff]   ;;  %v3134_v12 = vld [vmem:[%s4500_s4 + $0xd0] ss:$8 sps:$4 sm:$0xff]  }
 0x16c   : > { %v1064_v62 = vpop.f32.mrf.mxu0 }
 0x16d   : > { %v1065_v28 = vadd.f32 %v1064_v62, %v4548_v6  ;;  %v1135_v47 = vmax.f32 %v1063_v22, 0.0  ;;  %v1129_v62 = vmax.f32 %v1049_v20, 0.0  ;;  %v4558_v6 = vld [vmem:[#allocation18_spill] sm:$0xff] }
 0x16e   : > { %v1068_v40 = vpop.f32.mrf.mxu0  ;;  %v1023_v15 = vadd.f32 %v3906_v11, %v4558_v6  ;;  %v3096_v11 = vld [vmem:[%s4500_s4 + $0x14] ss:$8 sps:$4 sm:$0xff]   ;;  %v3128_v20 = vld [vmem:[%s4500_s4 + $0xb0] ss:$8 sps:$4 sm:$0xff]  }
 0x16f   : > { %v1069_v19 = vadd.f32 %v1068_v40, %v4549_v35  ;;  %v1136_v7 = vmax.f32 %v1065_v28, 0.0  ;;  %v1169_v44 = vpack.c.bf16 %v1135_v47, %v1133_v34  ;;  %v4557_v40 = vld [vmem:[#allocation15_spill] sm:$0xff]  ;;  %v1167_v48 = vpack.c.bf16 %v1131_v39, %v1129_v62 }
 0x170   : > { %v1070_v16 = vpop.f32.mrf.mxu0  ;;  %v1031_v42 = vadd.f32 %v3916_v38, %v4557_v40  ;;  %v1025_v28 = vadd.f32 %v3910_v37, %v4558_v6  ;;  %v1029_v9 = vadd.f32 %v3914_v45, %v4557_v40  ;;  %v1119_v22 = vmax.f32 %v1023_v15, 0.0  ;;  %v3119_v47 = vld [vmem:[%s4500_s4 + $0x80] ss:$8 sps:$4 sm:$0xff]   ;;  %v3129_v34 = vld [vmem:[%s4500_s4 + $0xc4] ss:$8 sps:$4 sm:$0xff]  }
 0x171   : > { %v1071_v52 = vadd.f32 %v1070_v16, %v4549_v35  ;;  %v1137_v33 = vmax.f32 %v1069_v19, 0.0  ;;  %v1170_v5 = vpack.c.bf16 %v1136_v7, %v1134_v4  ;;  %v1126_v16 = vmax.f32 %v1041_v54, 0.0  ;;  %v3104_v7 = vld [vmem:[%s4500_s4 + $0x30] ss:$8 sps:$4 sm:$0xff]   ;;  %v3114_v4 = vld [vmem:[%s4500_s4 + $0x74] ss:$8 sps:$4 sm:$0xff]  }
 0x172   : > { %v1072_v0 = vpop.f32.mrf.mxu0  ;;  %v1123_v19 = vmax.f32 %v1033_v10, 0.0  ;;  %v1120_v2 = vmax.f32 %v1025_v28, 0.0  ;;  %v3132_v54 = vld [vmem:[%s4500_s4 + $0xd4] ss:$8 sps:$4 sm:$0xff]   ;;  %v3137_v39 = vld [vmem:[%s4500_s4 + $0xe0] ss:$8 sps:$4 sm:$0xff]  }
 0x173   : > { %v1073_v31 = vadd.f32 %v1072_v0, %v4550_v53  ;;  %v1138_v24 = vmax.f32 %v1071_v52, 0.0  ;;  %v1127_v0 = vmax.f32 %v1043_v58, 0.0  ;;  %v1166_v35 = vpack.c.bf16 %v1128_v21, %v1126_v16  ;;  %v3135_v58 = vld [vmem:[%s4500_s4 + $0xe4] ss:$8 sps:$4 sm:$0xff]   ;;  %v4051_v21 = vpop.permute.xlu0 %1309 }
 0x174   : > { %v1074_v8 = vpop.f32.mrf.mxu0  ;;  %v1125_v52 = vmax.f32 %v1039_v61, 0.0 }
 0x175   : > { %v1075_v57 = vadd.f32 %v1074_v8, %v4550_v53  ;;  %v1139_v23 = vmax.f32 %v1073_v31, 0.0  ;;  %v4559_v53 = vld [vmem:[#allocation17_spill] sm:$0xff]  ;;  %v1122_v31 = vmax.f32 %v1031_v42, 0.0 }
 0x176   : > { %v1021_v38 = vadd.f32 %v3900_v43, %v4559_v53  ;;  %v1165_v8 = vpack.c.bf16 %v1127_v0, %v1125_v52  ;;  %v1019_v37 = vadd.f32 %v3894_v25, %v4559_v53  ;;  %v3093_v25 = vld [vmem:[%s4500_s4] ss:$8 sps:$4 sm:$0xff]  }
 0x177   : > { %v1140_v29 = vmax.f32 %v1075_v57, 0.0  ;;  %v1171_v59 = vpack.c.bf16 %v1139_v23, %v1137_v33  ;;  %v1164_v36 = vpack.c.bf16 %v1124_v56, %v1122_v31  ;;  %v1121_v57 = vmax.f32 %v1029_v9, 0.0  ;;  %v3110_v33 = vld [vmem:[%s4500_s4 + $0x50] ss:$8 sps:$4 sm:$0xff]   ;;  %v4055_v61 = vpop.permute.xlu0 %1299 }
 0x178   : > { %v1118_v45 = vmax.f32 %v1021_v38, 0.0  ;;  %v1117_v43 = vmax.f32 %v1019_v37, 0.0 }
 0x179   : > { %v1172_v30 = vpack.c.bf16 %v1140_v29, %v1138_v24  ;;  %v1163_v23 = vpack.c.bf16 %v1123_v19, %v1121_v57  ;;  %v3105_v24 = vld [vmem:[%s4500_s4 + $0x44] ss:$8 sps:$4 sm:$0xff]   ;;  %v3107_v29 = vld [vmem:[%s4500_s4 + $0x40] ss:$8 sps:$4 sm:$0xff]  }
 0x17a   : > { %v1162_v18 = vpack.c.bf16 %v1120_v2, %v1118_v45  ;;  %v1161_v14 = vpack.c.bf16 %v1119_v22, %v1117_v43 }
 0x17b   : > { %1573 = vmatprep.subr.bf16.mxu1 %v1172_v30  ;;  %v3116_v30 = vld [vmem:[%s4500_s4 + $0x70] ss:$8 sps:$4 sm:$0xff]   ;;  %v4059_v40 = vpop.permute.xlu0 %1289 }
 0x17c   : > { %1574 = vmatpush2.bf16.msra.mxu1 %v1171_v59  ;;  %v3120_v59 = vld [vmem:[%s4500_s4 + $0x94] ss:$8 sps:$4 sm:$0xff]  }
 0x17d   : > { %1575 = vmatprep.subr.bf16.mxu1 %v1170_v5  ;;  %v3126_v5 = vld [vmem:[%s4500_s4 + $0xb4] ss:$8 sps:$4 sm:$0xff]  }
 0x17f   : > { %v4063_v16 = vpop.permute.xlu0 %1279 }
 0x180   : > { %1576 = vmatpush2.bf16.msra.mxu1 %v1169_v44  ;;  %v3138_v44 = vld [vmem:[%s4500_s4 + $0xf4] ss:$8 sps:$4 sm:$0xff]  }
 0x181   : > { %1577 = vmatprep.subr.bf16.mxu1 %v1168_v46  ;;  %v4053_v46 = vpop.permute.xlu1 %1314 }
 0x183   : > { %v4067_v0 = vpop.permute.xlu0 %1269 }
 0x184   : > { %1578 = vmatpush2.bf16.msra.mxu1 %v1167_v48 }
 0x185   : > { %1579 = vmatprep.subr.bf16.mxu1 %v1166_v35  ;;  %v4057_v62 = vpop.permute.xlu1 %1304 }
 0x187   : > { %v4071_v6 = vpop.permute.xlu0 %1259 }
 0x188   : > { %1580 = vmatpush2.bf16.msra.mxu1 %v1165_v8 }
 0x189   : > { %1581 = vmatprep.subr.bf16.mxu1 %v1164_v36  ;;  %v4061_v42 = vpop.permute.xlu1 %1294 }
 0x18b   : > { %v1250_v56 = vpop.permute.xlu0 %1249 }
 0x18c   : > { %1582 = vmatpush2.bf16.msra.mxu1 %v1163_v23 }
 0x18d   : > { %1583 = vmatprep.subr.bf16.mxu1 %v1162_v18  ;;  %v4065_v10 = vpop.permute.xlu1 %1284 }
 0x18f   : > { %v1240_v52 = vpop.permute.xlu0 %1239 }
 0x190   : > { %1584 = vmatpush2.bf16.msra.mxu1 %v1161_v14 }
 0x191   : > { %1585 = vmatprep.subr.bf16.mxu1 %v3904_v26  ;;  %v3098_v26 = vld [vmem:[%s4500_s4 + $0x10] ss:$8 sps:$4 sm:$0xff]   ;;  %v4069_v48 = vpop.permute.xlu1 %1274 }
 0x194   : > { %1586 = vmatpush2.bf16.msra.mxu1 %v3896_v1  ;;  %v3102_v1 = vld [vmem:[%s4500_s4 + $0x34] ss:$8 sps:$4 sm:$0xff]  }
 0x195   : > { %1587 = vmatprep.subr.bf16.mxu1 %v3876_v63  ;;  %v3099_v63 = vld [vmem:[%s4500_s4 + $0x24] ss:$8 sps:$4 sm:$0xff]   ;;  %v4073_v28 = vpop.permute.xlu1 %1264 }
 0x198   : > { %1588 = vmatpush2.bf16.msra.mxu1 %v3870_v41  ;;  %v3101_v41 = vld [vmem:[%s4500_s4 + $0x20] ss:$8 sps:$4 sm:$0xff]  }
 0x199   : > { %v1255_v35 = vpop.permute.xlu1 %1254 }
 0x19b   : > { %1590 = vmatmul.mubr.bf16.vlgmr.msra.gmra.mxu1 %v3093_v25 }
 0x19c   : > { %1599 = vmatprep.mubr.bf16.mxu1 %v3096_v11 }
 0x19d   : > { %v1245_v31 = vpop.permute.xlu1 %1244 }
 0x1a3   : > { %1600 = vmatmul.mubr.bf16.gmra.mxu1 %v3098_v26 }
 0x1a4   : > { %1609 = vmatprep.mubr.bf16.mxu1 %v3099_v63 }
 0x1ab   : > { %1610 = vmatmul.mubr.bf16.gmra.mxu1 %v3101_v41 }
 0x1ac   : > { %1619 = vmatprep.mubr.bf16.mxu1 %v3102_v1 }
 0x1b3   : > { %1620 = vmatmul.mubr.bf16.gmra.mxu1 %v3104_v7 }
 0x1b4   : > { %1629 = vmatprep.mubr.bf16.mxu1 %v3105_v24 }
 0x1bb   : > { %1630 = vmatmul.mubr.bf16.gmra.mxu1 %v3107_v29 }
 0x1bc   : > { %1639 = vmatprep.mubr.bf16.mxu1 %v3108_v49 }
 0x1c3   : > { %1640 = vmatmul.mubr.bf16.gmra.mxu1 %v3110_v33 }
 0x1c4   : > { %1649 = vmatprep.mubr.bf16.mxu1 %v3111_v51 }
 0x1cb   : > { %1650 = vmatmul.mubr.bf16.gmra.mxu1 %v3113_v50 }
 0x1cc   : > { %1659 = vmatprep.mubr.bf16.mxu1 %v3114_v4 }
 0x1d3   : > { %1660 = vmatmul.mubr.bf16.gmra.mxu1 %v3116_v30 }
 0x1d4   : > { %1669 = vmatprep.mubr.bf16.mxu1 %v3117_v60 }
 0x1db   : > { %1670 = vmatmul.mubr.bf16.gmra.mxu1 %v3119_v47  ;;  %v4091_v47 = vpop.permute.xlu0 %1389 }
 0x1dc   : > { %1679 = vmatprep.mubr.bf16.mxu1 %v3120_v59 }
 0x1e3   : > { %1680 = vmatmul.mubr.bf16.gmra.mxu1 %v3122_v55  ;;  %v4095_v55 = vpop.permute.xlu1 %1394 }
 0x1e4   : > { %1689 = vmatprep.mubr.bf16.mxu1 %v3123_v3 }
 0x1eb   : > { %1690 = vmatmul.mubr.bf16.gmra.mxu1 %v3125_v27 }
 0x1ec   : > { %1699 = vmatprep.mubr.bf16.mxu1 %v3126_v5  ;;  %v4101_v5 = vpop.permute.xlu0 %1379 }
 0x1f3   : > { %1700 = vmatmul.mubr.bf16.gmra.mxu1 %v3128_v20 }
 0x1f4   : > { %1709 = vmatprep.mubr.bf16.mxu1 %v3129_v34  ;;  %v4103_v34 = vpop.permute.xlu1 %1384 }
 0x1fb   : > { %1710 = vmatmul.mubr.bf16.gmra.mxu1 %v3131_v32 }
 0x1fc   : > { %1719 = vmatprep.mubr.bf16.mxu1 %v3132_v54 }
 0x203   : > { %1720 = vmatmul.mubr.bf16.gmra.mxu1 %v3134_v12  ;;  %v3143_v12 = vld [vmem:[%s4501_s5 + $0x4] ss:$8 sps:$4 sm:$0xff]  }
 0x204   : > { %1729 = vmatprep.mubr.bf16.mxu1 %v3135_v58  ;;  %v4110_v58 = vpop.permute.xlu0 %1369  ;;  %2070 = vmatprep.mubr.bf16.mxu0 %v3143_v12 }
 0x20b   : > { %1730 = vmatmul.mubr.bf16.gmra.mxu1 %v3137_v39 }
 0x20c   : > { %1739 = vmatprep.mubr.bf16.mxu1 %v3138_v44  ;;  %v4114_v44 = vpop.permute.xlu1 %1374 }
 0x213   : > { %1740 = vmatmul.mubr.bf16.gmra.mxu1 %v3140_v13 }
 0x214   : > { %2311 = vmatprep.mubr.bf16.mxu1 %v4560_v17 }
 0x25b   : > { %v1591_v9 = vpop.f32.mrf.mxu1 }
 0x25c   : > { %v1592_v38 = vadd.f32 %v1591_v9, %v1240_v52 }
 0x25d   : > { %v1593_v53 = vpop.f32.mrf.mxu1 }
 0x25e   : > { %v1594_v19 = vadd.f32 %v1593_v53, %v1240_v52  ;;  %v1750_v36 = vmax.f32 %v1592_v38, 0.0  ;;  %v4118_v52 = vpop.permute.xlu1 %1364 }
 0x25f   : > { %v1595_v15 = vpop.f32.mrf.mxu1  ;;  %4562 = vst [vmem:[#allocation7_spill] sm:$0xff] %v4118_v52 }
 0x260   : > { %v1596_v8 = vadd.f32 %v1595_v15, %v1245_v31  ;;  %v1751_v22 = vmax.f32 %v1594_v19, 0.0 }
 0x261   : > { %v1597_v2 = vpop.f32.mrf.mxu1 }
 0x262   : > { %v1752_v37 = vmax.f32 %v1596_v8, 0.0  ;;  %v1598_v57 = vadd.f32 %v1597_v2, %v1245_v31  ;;  %v4122_v19 = vpop.permute.xlu1 %1354 }
 0x263   : > { %v1601_v45 = vpop.f32.mrf.mxu1  ;;  %4564 = vst [vmem:[#allocation9_spill] sm:$0xff] %v4122_v19 }
 0x264   : > { %v4075_v23 = vpack.c.bf16 %v1752_v37, %v1750_v36  ;;  %v1753_v18 = vmax.f32 %v1598_v57, 0.0  ;;  %v1602_v25 = vadd.f32 %v1601_v45, %v1250_v56 }
 0x265   : > { %v1603_v43 = vpop.f32.mrf.mxu1 }
 0x266   : > { %v4077_v14 = vpack.c.bf16 %v1753_v18, %v1751_v22  ;;  %v1604_v26 = vadd.f32 %v1603_v43, %v1250_v56  ;;  %v1754_v1 = vmax.f32 %v1602_v25, 0.0  ;;  %v4126_v57 = vpop.permute.xlu1 %1344 }
 0x267   : > { %v1605_v11 = vpop.f32.mrf.mxu1  ;;  %4566 = vst [vmem:[#allocation11_spill] sm:$0xff] %v4126_v57 }
 0x268   : > { %v1606_v63 = vadd.f32 %v1605_v11, %v1255_v35  ;;  %v1755_v49 = vmax.f32 %v1604_v26, 0.0 }
 0x269   : > { %v1607_v41 = vpop.f32.mrf.mxu1 }
 0x26a   : > { %v1756_v7 = vmax.f32 %v1606_v63, 0.0  ;;  %v1608_v24 = vadd.f32 %v1607_v41, %v1255_v35  ;;  %v4116_v35 = vpop.permute.xlu0 %1359  ;;  %v4133_v63 = vpop.permute.xlu1 %1334 }
 0x26b   : > { %v4079_v29 = vpop.f32.mrf.mxu1  ;;  %4561 = vst [vmem:[#allocation10_spill] sm:$0xff] %v4116_v35 }
 0x26c   : > { %v4081_v33 = vpack.c.bf16 %v1756_v7, %v1754_v1  ;;  %v1757_v51 = vmax.f32 %v1608_v24, 0.0 }
 0x26d   : > { %v4083_v50 = vpop.f32.mrf.mxu1 }
 0x26e   : > { %v4085_v4 = vpack.c.bf16 %v1757_v51, %v1755_v49  ;;  %v4120_v31 = vpop.permute.xlu0 %1349 }
 0x26f   : > { %v4087_v30 = vpop.f32.mrf.mxu1  ;;  %4563 = vst [vmem:[#allocation8_spill] sm:$0xff] %v4120_v31 }
 0x271   : > { %v4089_v60 = vpop.f32.mrf.mxu1 }
 0x272   : > { %v4124_v36 = vpop.permute.xlu0 %1339 }
 0x273   : > { %v4093_v59 = vpop.f32.mrf.mxu1  ;;  %4565 = vst [vmem:[#allocation12_spill] sm:$0xff] %v4124_v36 }
 0x275   : > { %v4097_v3 = vpop.f32.mrf.mxu1 }
 0x276   : > { %v4128_v18 = vpop.permute.xlu0 %1329 }
 0x277   : > { %v4099_v27 = vpop.f32.mrf.mxu1 }
 0x279   : > { %v1627_v20 = vpop.f32.mrf.mxu1 }
 0x27a   : > { %v1320_v57 = vpop.permute.xlu0 %1319 }
 0x27b   : > { %v4105_v32 = vpop.f32.mrf.mxu1 }
 0x27d   : > { %v1633_v54 = vpop.f32.mrf.mxu1 }
 0x27f   : > { %v4112_v39 = vpop.f32.mrf.mxu1 }
 0x281   : > { %v1637_v13 = vpop.f32.mrf.mxu1 }
 0x283   : > { %v1641_v56 = vpop.f32.mrf.mxu1 }
 0x285   : > { %v1643_v9 = vpop.f32.mrf.mxu1 }
 0x287   : > { %v1645_v53 = vpop.f32.mrf.mxu1 }
 0x289   : > { %v1647_v38 = vpop.f32.mrf.mxu1 }
 0x28a   : > { %v1648_v17 = vadd.f32 %v1647_v38, %v4061_v42 }
 0x28b   : > { %v1651_v15 = vpop.f32.mrf.mxu1 }
 0x28d   : > { %v1653_v8 = vpop.f32.mrf.mxu1 }
 0x28e   : > { %v1654_v7 = vadd.f32 %v1653_v8, %v4055_v61 }
 0x28f   : > { %v1655_v2 = vpop.f32.mrf.mxu1 }
 0x290   : > { %v1656_v49 = vadd.f32 %v1655_v2, %v4057_v62  ;;  %v1646_v2 = vadd.f32 %v1645_v53, %v4061_v42 }
 0x291   : > { %v1657_v37 = vpop.f32.mrf.mxu1 }
 0x292   : > { %v1658_v25 = vadd.f32 %v1657_v37, %v4057_v62  ;;  %v1638_v62 = vadd.f32 %v1637_v13, %v4065_v10 }
 0x293   : > { %v1661_v45 = vpop.f32.mrf.mxu1 }
 0x294   : > { %v1662_v41 = vadd.f32 %v1661_v45, %v4051_v21  ;;  %v1777_v37 = vmax.f32 %v1658_v25, 0.0  ;;  %v1775_v45 = vmax.f32 %v1654_v7, 0.0 }
 0x295   : > { %v1663_v22 = vpop.f32.mrf.mxu1 }
 0x296   : > { %v1664_v11 = vadd.f32 %v1663_v22, %v4051_v21  ;;  %v1778_v31 = vmax.f32 %v1662_v41, 0.0  ;;  %v1644_v21 = vadd.f32 %v1643_v9, %v4059_v40  ;;  %v1634_v9 = vadd.f32 %v1633_v54, %v4063_v16 }
 0x297   : > { %v1665_v43 = vpop.f32.mrf.mxu1 }
 0x298   : > { %v1666_v26 = vadd.f32 %v1665_v43, %v4053_v46  ;;  %v1779_v36 = vmax.f32 %v1664_v11, 0.0  ;;  %v1652_v43 = vadd.f32 %v1651_v15, %v4055_v61  ;;  %v1773_v11 = vmax.f32 %v1648_v17, 0.0 }
 0x299   : > { %v1667_v1 = vpop.f32.mrf.mxu1  ;;  %v1628_v61 = vadd.f32 %v1627_v20, %v4069_v48  ;;  %v1642_v15 = vadd.f32 %v1641_v56, %v4059_v40  ;;  %v1771_v13 = vmax.f32 %v1644_v21, 0.0  ;;  %v1636_v17 = vadd.f32 %v4112_v39, %v4065_v10 }
 0x29a   : > { %v1668_v24 = vadd.f32 %v1667_v1, %v4053_v46  ;;  %v1780_v51 = vmax.f32 %v1666_v26, 0.0  ;;  %v1325_v46 = vpop.permute.xlu1 %1324  ;;  %v1776_v26 = vmax.f32 %v1656_v49, 0.0  ;;  %v1827_v1 = vpack.c.bf16 %v1777_v37, %v1775_v45 }
 0x29b   : > { %v1671_v12 = vpop.f32.mrf.mxu1  ;;  %v1825_v20 = vpack.c.bf16 %v1773_v11, %v1771_v13  ;;  %v1632_v56 = vadd.f32 %v4105_v32, %v4063_v16  ;;  %v1767_v37 = vmax.f32 %v1634_v9, 0.0  ;;  %v1768_v21 = vmax.f32 %v1636_v17, 0.0 }
 0x29c   : > { %v1781_v22 = vmax.f32 %v1668_v24, 0.0  ;;  %v1672_v35 = vadd.f32 %v1671_v12, %v1320_v57  ;;  %v1828_v38 = vpack.c.bf16 %v1780_v51, %v1778_v31  ;;  %v1769_v31 = vmax.f32 %v1638_v62, 0.0 }
 0x29d   : > { %v1673_v19 = vpop.f32.mrf.mxu1  ;;  %v1770_v12 = vmax.f32 %v1642_v15, 0.0  ;;  %v1765_v45 = vmax.f32 %v1628_v61, 0.0  ;;  %v1614_v62 = vadd.f32 %v4083_v50, %v4071_v6  ;;  %v1612_v15 = vadd.f32 %v4079_v29, %v4071_v6 }
 0x29e   : > { %v1829_v8 = vpack.c.bf16 %v1781_v22, %v1779_v36  ;;  %v1674_v24 = vadd.f32 %v1673_v19, %v1320_v57  ;;  %v1774_v36 = vmax.f32 %v1652_v43, 0.0  ;;  %v1782_v7 = vmax.f32 %v1672_v35, 0.0 }
 0x29f   : > { %v1675_v25 = vpop.f32.mrf.mxu1  ;;  %v1772_v19 = vmax.f32 %v1646_v2, 0.0  ;;  %v1618_v22 = vadd.f32 %v4089_v60, %v4073_v28  ;;  %v1626_v43 = vadd.f32 %v4099_v27, %v4069_v48  ;;  %v1622_v2 = vadd.f32 %v4093_v59, %v4067_v0 }
 0x2a0   : > { %v1676_v52 = vadd.f32 %v1675_v25, %v1325_v46  ;;  %2038 = vmatprep.subr.bf16.mxu0 %v1829_v8  ;;  %v1826_v57 = vpack.c.bf16 %v1776_v26, %v1774_v36  ;;  %v1783_v51 = vmax.f32 %v1674_v24, 0.0  ;;  %v1823_v8 = vpack.c.bf16 %v1769_v31, %v1767_v37 }
 0x2a1   : > { %v1677_v41 = vpop.f32.mrf.mxu1  ;;  %2039 = vmatpush1.bf16.msra.mxu0 %v1828_v38  ;;  %v1824_v16 = vpack.c.bf16 %v1772_v19, %v1770_v12  ;;  %v1766_v26 = vmax.f32 %v1632_v56, 0.0  ;;  %v1761_v11 = vmax.f32 %v1618_v22, 0.0  ;;  %v1762_v36 = vmax.f32 %v1622_v2, 0.0 }
 0x2a2   : > { %v1784_v42 = vmax.f32 %v1676_v52, 0.0  ;;  %v1678_v53 = vadd.f32 %v1677_v41, %v1325_v46  ;;  %2040 = vmatprep.subr.bf16.mxu0 %v1827_v1  ;;  %v1624_v52 = vadd.f32 %v4097_v3, %v4067_v0  ;;  %v1764_v1 = vmax.f32 %v1626_v43, 0.0 }
 0x2a3   : > { %v1681_v49 = vpop.f32.mrf.mxu1  ;;  %v1822_v24 = vpack.c.bf16 %v1768_v21, %v1766_v26 }
 0x2a4   : > { %v4149_v54 = vpack.c.bf16 %v1784_v42, %v1782_v7  ;;  %v1785_v40 = vmax.f32 %v1678_v53, 0.0  ;;  %v1682_v39 = vadd.f32 %v1681_v49, %v4128_v18  ;;  %v1763_v38 = vmax.f32 %v1624_v52, 0.0 }
 0x2a5   : > { %v1683_v35 = vpop.f32.mrf.mxu1  ;;  %2041 = vmatpush1.bf16.msra.mxu0 %v1826_v57  ;;  %v1758_v53 = vmax.f32 %v1612_v15, 0.0 }
 0x2a6   : > { %v4155_v10 = vpack.c.bf16 %v1785_v40, %v1783_v51  ;;  %2042 = vmatprep.subr.bf16.mxu0 %v1825_v20  ;;  %v1684_v46 = vadd.f32 %v1683_v35, %v4128_v18  ;;  %v1786_v48 = vmax.f32 %v1682_v39, 0.0  ;;  %v1616_v18 = vadd.f32 %v4087_v30, %v4073_v28 }
 0x2a7   : > { %v1685_v32 = vpop.f32.mrf.mxu1  ;;  %v1821_v50 = vpack.c.bf16 %v1765_v45, %v1763_v38  ;;  %v1820_v30 = vpack.c.bf16 %v1764_v1, %v1762_v36  ;;  %v4568_v36 = vld [vmem:[#allocation10_spill] sm:$0xff] }
 0x2a8   : > { %v1686_v3 = vadd.f32 %v1685_v32, %v4133_v63  ;;  %v1787_v9 = vmax.f32 %v1684_v46, 0.0  ;;  %v1760_v28 = vmax.f32 %v1616_v18, 0.0 }
 0x2a9   : > { %v1687_v60 = vpop.f32.mrf.mxu1  ;;  %2043 = vmatpush1.bf16.msra.mxu0 %v1824_v16 }
 0x2aa   : > { %v1788_v27 = vmax.f32 %v1686_v3, 0.0  ;;  %v1688_v25 = vadd.f32 %v1687_v60, %v4133_v63  ;;  %2044 = vmatprep.subr.bf16.mxu0 %v1823_v8  ;;  %v1759_v63 = vmax.f32 %v1614_v62, 0.0  ;;  %v1818_v31 = vpack.c.bf16 %v1760_v28, %v1758_v53 }
 0x2ab   : > { %v4171_v61 = vpop.f32.mrf.mxu1 }
 0x2ac   : > { %v4173_v0 = vpack.c.bf16 %v1788_v27, %v1786_v48  ;;  %v1789_v59 = vmax.f32 %v1688_v25, 0.0  ;;  %v1819_v42 = vpack.c.bf16 %v1761_v11, %v1759_v63 }
 0x2ad   : > { %v4177_v41 = vpop.f32.mrf.mxu1  ;;  %2045 = vmatpush1.bf16.msra.mxu0 %v1822_v24 }
 0x2ae   : > { %v4179_v13 = vpack.c.bf16 %v1789_v59, %v1787_v9  ;;  %2046 = vmatprep.subr.bf16.mxu0 %v1821_v50 }
 0x2af   : > { %v4181_v7 = vpop.f32.mrf.mxu1 }
 0x2b1   : > { %v4183_v17 = vpop.f32.mrf.mxu1  ;;  %2047 = vmatpush1.bf16.msra.mxu0 %v1820_v30 }
 0x2b2   : > { %2048 = vmatprep.subr.bf16.mxu0 %v1819_v42 }
 0x2b3   : > { %v4185_v6 = vpop.f32.mrf.mxu1 }
 0x2b5   : > { %v4187_v29 = vpop.f32.mrf.mxu1  ;;  %2049 = vmatpush1.bf16.msra.mxu0 %v1818_v31 }
 0x2b6   : > { %2050 = vmatprep.subr.bf16.mxu0 %v4085_v4 }
 0x2b7   : > { %v4190_v19 = vpop.f32.mrf.mxu1 }
 0x2b9   : > { %v1707_v57 = vpop.f32.mrf.mxu1  ;;  %2051 = vmatpush1.bf16.msra.mxu0 %v4081_v33 }
 0x2ba   : > { %2052 = vmatprep.subr.bf16.mxu0 %v4077_v14 }
 0x2bb   : > { %v1711_v49 = vpop.f32.mrf.mxu1 }
 0x2bd   : > { %v1713_v20 = vpop.f32.mrf.mxu1  ;;  %2053 = vmatpush1.bf16.msra.mxu0 %v4075_v23 }
 0x2bf   : > { %v1715_v51 = vpop.f32.mrf.mxu1 }
 0x2c1   : > { %v1717_v40 = vpop.f32.mrf.mxu1 }
 0x2c3   : > { %v1721_v56 = vpop.f32.mrf.mxu1 }
 0x2c4   : > { %v1722_v59 = vadd.f32 %v1721_v56, %v4110_v58 }
 0x2c5   : > { %v1723_v12 = vpop.f32.mrf.mxu1 }
 0x2c6   : > { %v1724_v25 = vadd.f32 %v1723_v12, %v4110_v58 }
 0x2c7   : > { %v1725_v35 = vpop.f32.mrf.mxu1 }
 0x2c8   : > { %v1726_v11 = vadd.f32 %v1725_v35, %v4114_v44  ;;  %v1803_v63 = vmax.f32 %v1724_v25, 0.0  ;;  %v1802_v35 = vmax.f32 %v1722_v59, 0.0  ;;  %v3161_v25 = vld [vmem:[%s4501_s5 + $0x60] ss:$8 sps:$4 sm:$0xff]  }
 0x2c9   : > { %v1727_v52 = vpop.f32.mrf.mxu1 }
 0x2ca   : > { %v1728_v2 = vadd.f32 %v1727_v52, %v4114_v44  ;;  %v1804_v30 = vmax.f32 %v1726_v11, 0.0  ;;  %v4569_v44 = vld [vmem:[#allocation9_spill] sm:$0xff]  ;;  %v4570_v52 = vld [vmem:[#allocation8_spill] sm:$0xff]  ;;  %v4573_v11 = vmov 0  }
 0x2cb   : > { %v1731_v37 = vpop.f32.mrf.mxu1  ;;  %v1708_v53 = vadd.f32 %v1707_v57, %v4569_v44  ;;  %v1704_v58 = vadd.f32 %v4187_v29, %v4570_v52 }
 0x2cc   : > { %v1732_v48 = vadd.f32 %v1731_v37, %v4101_v5 }
 0x2cd   : > { %v1733_v39 = vpop.f32.mrf.mxu1  ;;  %v1797_v57 = vmax.f32 %v1708_v53, 0.0 }
 0x2ce   : > { %v1734_v8 = vadd.f32 %v1733_v39, %v4101_v5  ;;  %v1806_v15 = vmax.f32 %v1732_v48, 0.0  ;;  %v1714_v5 = vadd.f32 %v1713_v20, %v4568_v36  ;;  %v1706_v20 = vadd.f32 %v4190_v19, %v4569_v44  ;;  %v4571_v39 = vld [vmem:[#allocation11_spill] sm:$0xff]  ;;  %v3158_v48 = vld [vmem:[%s4501_s5 + $0x50] ss:$8 sps:$4 sm:$0xff]  }
 0x2cf   : > { %v1735_v4 = vpop.f32.mrf.mxu1  ;;  %v1696_v19 = vadd.f32 %v4181_v7, %v4571_v39  ;;  %v3144_v7 = vld [vmem:[%s4501_s5 + $0x14] ss:$8 sps:$4 sm:$0xff]  }
 0x2d0   : > { %v1736_v3 = vadd.f32 %v1735_v4, %v4103_v34  ;;  %v1807_v18 = vmax.f32 %v1734_v8, 0.0  ;;  %v1799_v56 = vmax.f32 %v1714_v5, 0.0  ;;  %v1698_v4 = vadd.f32 %v4183_v17, %v4571_v39  ;;  %v3172_v44 = vld [vmem:[%s4503_s7 + $0x10] sm:$0xff]  }
 0x2d1   : > { %v1737_v22 = vpop.f32.mrf.mxu1  ;;  %v1792_v8 = vmax.f32 %v1696_v19, 0.0 }
 0x2d2   : > { %v1738_v33 = vadd.f32 %v1737_v22, %v4103_v34  ;;  %v1808_v1 = vmax.f32 %v1736_v3, 0.0  ;;  %v1805_v34 = vmax.f32 %v1728_v2, 0.0  ;;  %v3152_v2 = vld [vmem:[%s4501_s5 + $0x30] ss:$8 sps:$4 sm:$0xff]  }
 0x2d3   : > { %v1741_v43 = vpop.f32.mrf.mxu1 }
 0x2d4   : > { %v1742_v23 = vadd.f32 %v1741_v43, %v4091_v47  ;;  %v1809_v26 = vmax.f32 %v1738_v33, 0.0  ;;  %v1842_v42 = vpack.c.bf16 %v1808_v1, %v1806_v15  ;;  %v1841_v12 = vpack.c.bf16 %v1805_v34, %v1803_v63  ;;  %v4279_v1 = vpop.permute.xlu0 %1950  ;;  %v3168_v15 = vld [vmem:[%s4503_s7] sm:$0xff]  }
 0x2d5   : > { %v1743_v21 = vpop.f32.mrf.mxu1  ;;  %v1796_v33 = vmax.f32 %v1706_v20, 0.0 }
 0x2d6   : > { %v1744_v14 = vadd.f32 %v1743_v21, %v4091_v47  ;;  %v1810_v27 = vmax.f32 %v1742_v23, 0.0  ;;  %v1843_v9 = vpack.c.bf16 %v1809_v26, %v1807_v18  ;;  %v4572_v21 = vld [vmem:[#allocation12_spill] sm:$0xff]  ;;  %v3162_v18 = vld [vmem:[%s4501_s5 + $0x74] ss:$8 sps:$4 sm:$0xff]  }
 0x2d7   : > { %v1745_v16 = vpop.f32.mrf.mxu1  ;;  %v1694_v29 = vadd.f32 %v4177_v41, %v4572_v21  ;;  %v1692_v17 = vadd.f32 %v4171_v61, %v4572_v21  ;;  %v3141_v61 = vld [vmem:[%s4501_s5] ss:$8 sps:$4 sm:$0xff]   ;;  %v3153_v26 = vld [vmem:[%s4501_s5 + $0x44] ss:$8 sps:$4 sm:$0xff]  }
 0x2d8   : > { %v1746_v32 = vadd.f32 %v1745_v16, %v4095_v55  ;;  %v1811_v60 = vmax.f32 %v1744_v14, 0.0  ;;  %v1795_v16 = vmax.f32 %v1704_v58, 0.0  ;;  %v4289_v59 = vpop.permute.xlu0 %1940 }
 0x2d9   : > { %v1747_v45 = vpop.f32.mrf.mxu1  ;;  %v1790_v41 = vmax.f32 %v1692_v17, 0.0 }
 0x2da   : > { %v1748_v46 = vadd.f32 %v1747_v45, %v4095_v55  ;;  %v1812_v62 = vmax.f32 %v1746_v32, 0.0  ;;  %v4567_v55 = vld [vmem:[#allocation7_spill] sm:$0xff]  ;;  %v1793_v32 = vmax.f32 %v1698_v4, 0.0  ;;  %v1837_v23 = vpack.c.bf16 %v1797_v57, %v1795_v16 }
 0x2db   : > { %v1718_v50 = vadd.f32 %v1717_v40, %v4567_v55  ;;  %v1716_v28 = vadd.f32 %v1715_v51, %v4567_v55  ;;  %v1712_v40 = vadd.f32 %v1711_v49, %v4568_v36  ;;  %v1840_v51 = vpack.c.bf16 %v1804_v30, %v1802_v35  ;;  %v2360_v55 = vld [vmem:[%s497_s0] sm:$0xff]  ;;  %s2792_s0 = scalar_lea.sflag [#allocation4], %s3392_s17 }
 0x2dc   : > { %v1813_v38 = vmax.f32 %v1748_v46, 0.0  ;;  %v1844_v24 = vpack.c.bf16 %v1812_v62, %v1810_v27  ;;  %v1702_v49 = vadd.f32 %v4185_v6, %v4570_v52  ;;  %v1791_v6 = vmax.f32 %v1694_v29, 0.0  ;;  %v3159_v27 = vld [vmem:[%s4501_s5 + $0x64] ss:$8 sps:$4 sm:$0xff]   ;;  %v4298_v5 = vpop.permute.xlu0 %1930 }
 0x2dd   : > { %v1801_v31 = vmax.f32 %v1718_v50, 0.0  ;;  %v1800_v37 = vmax.f32 %v1716_v28, 0.0  ;;  %v1798_v43 = vmax.f32 %v1712_v40, 0.0  ;;  %v1834_v62 = vpack.c.bf16 %v1792_v8, %v1790_v41  ;;  %v3170_v28 = vld [vmem:[%s4503_s7 + $0x8] sm:$0xff]   ;;  %v3174_v40 = vld [vmem:[%s4503_s7 + $0x18] sm:$0xff]  }
 0x2de   : > { %v1845_v47 = vpack.c.bf16 %v1813_v38, %v1811_v60  ;;  %v1794_v45 = vmax.f32 %v1702_v49, 0.0  ;;  %v1835_v3 = vpack.c.bf16 %v1793_v32, %v1791_v6  ;;  %v3155_v60 = vld [vmem:[%s4501_s5 + $0x40] ss:$8 sps:$4 sm:$0xff]   ;;  %v3156_v38 = vld [vmem:[%s4501_s5 + $0x54] ss:$8 sps:$4 sm:$0xff]   ;;  %v3001_v50 = vcombine.high %v2360_v55, %v2360_v55 }
 0x2df   : > { %v1839_v22 = vpack.c.bf16 %v1801_v31, %v1799_v56  ;;  %v1838_v14 = vpack.c.bf16 %v1800_v37, %v1798_v43  ;;  %v3000_v34 = vcombine.low %v2360_v55, %v2360_v55 }
 0x2e0   : > { %2054 = vmatprep.subr.bf16.mxu0 %v1845_v47  ;;  %v1836_v46 = vpack.c.bf16 %v1796_v33, %v1794_v45  ;;  %v3164_v47 = vld [vmem:[%s4501_s5 + $0x70] ss:$8 sps:$4 sm:$0xff]   ;;  %v4306_v30 = vpop.permute.xlu0 %1920 }
 0x2e1   : > { %2055 = vmatpush2.bf16.msra.mxu0 %v1844_v24  ;;  %v4285_v24 = vpop.permute.xlu1 %1955 }
 0x2e2   : > { %2056 = vmatprep.subr.bf16.mxu0 %v1843_v9  ;;  %v2401_v9 = vsel %vm2399_vm1, %v3000_v34, 0 }
 0x2e4   : > { %v4314_v53 = vpop.permute.xlu0 %1910 }
 0x2e5   : > { %2057 = vmatpush2.bf16.msra.mxu0 %v1842_v42  ;;  %v4294_v36 = vpop.permute.xlu1 %1945 }
 0x2e6   : > { %2058 = vmatprep.subr.bf16.mxu0 %v1841_v12 }
 0x2e8   : > { %v4320_v12 = vpop.permute.xlu0 %1900 }
 0x2e9   : > { %2059 = vmatpush2.bf16.msra.mxu0 %v1840_v51  ;;  %v4300_v63 = vpop.permute.xlu1 %1935 }
 0x2ea   : > { %2060 = vmatprep.subr.bf16.mxu0 %v1839_v22 }
 0x2ec   : > { %v1891_v52 = vpop.permute.xlu0 %1890 }
 0x2ed   : > { %2061 = vmatpush2.bf16.msra.mxu0 %v1838_v14  ;;  %v4309_v42 = vpop.permute.xlu1 %1925 }
 0x2ee   : > { %2062 = vmatprep.subr.bf16.mxu0 %v1837_v23 }
 0x2f0   : > { %v1881_v20 = vpop.permute.xlu0 %1880 }
 0x2f1   : > { %2063 = vmatpush2.bf16.msra.mxu0 %v1836_v46  ;;  %v4317_v31 = vpop.permute.xlu1 %1915 }
 0x2f2   : > { %2064 = vmatprep.subr.bf16.mxu0 %v1835_v3 }
 0x2f5   : > { %2065 = vmatpush2.bf16.msra.mxu0 %v1834_v62  ;;  %v4325_v35 = vpop.permute.xlu1 %1905 }
 0x2f6   : > { %2066 = vmatprep.subr.bf16.mxu0 %v4179_v13  ;;  %v3146_v13 = vld [vmem:[%s4501_s5 + $0x10] ss:$8 sps:$4 sm:$0xff]  }
 0x2f9   : > { %2067 = vmatpush2.bf16.msra.mxu0 %v4173_v0  ;;  %v3150_v0 = vld [vmem:[%s4501_s5 + $0x34] ss:$8 sps:$4 sm:$0xff]   ;;  %v1896_v58 = vpop.permute.xlu1 %1895 }
 0x2fa   : > { %2068 = vmatprep.subr.bf16.mxu0 %v4155_v10  ;;  %v3147_v10 = vld [vmem:[%s4501_s5 + $0x24] ss:$8 sps:$4 sm:$0xff]  }
 0x2fd   : > { %2069 = vmatpush2.bf16.msra.mxu0 %v4149_v54  ;;  %v3149_v54 = vld [vmem:[%s4501_s5 + $0x20] ss:$8 sps:$4 sm:$0xff]   ;;  %v1886_v39 = vpop.permute.xlu1 %1885 }
 0x2fe   : > { %3002 = vmatprep.subr.msk.bf16.mxu0 %vm2399_vm1, %v3001_v50 }
 0x300   : > { %2071 = vmatmul.mubr.bf16.vlgmr.msra.gmra.mxu0 %v3141_v61 }
 0x301   : > { %2080 = vmatprep.mubr.bf16.mxu0 %v3144_v7  ;;  %2421 = vmatpush1.bf16.msra.mxu0 %v2401_v9 }
 0x308   : > { %2081 = vmatmul.mubr.bf16.gmra.mxu0 %v3146_v13 }
 0x309   : > { %2090 = vmatprep.mubr.bf16.mxu0 %v3147_v10 }
 0x310   : > { %2091 = vmatmul.mubr.bf16.gmra.mxu0 %v3149_v54 }
 0x311   : > { %2100 = vmatprep.mubr.bf16.mxu0 %v3150_v0 }
 0x318   : > { %2101 = vmatmul.mubr.bf16.gmra.mxu0 %v3152_v2 }
 0x319   : > { %2110 = vmatprep.mubr.bf16.mxu0 %v3153_v26 }
 0x320   : > { %2111 = vmatmul.mubr.bf16.gmra.mxu0 %v3155_v60 }
 0x321   : > { %2120 = vmatprep.mubr.bf16.mxu0 %v3156_v38 }
 0x328   : > { %2121 = vmatmul.mubr.bf16.gmra.mxu0 %v3158_v48 }
 0x329   : > { %2130 = vmatprep.mubr.bf16.mxu0 %v3159_v27 }
 0x330   : > { %2131 = vmatmul.mubr.bf16.gmra.mxu0 %v3161_v25 }
 0x331   : > { %2140 = vmatprep.mubr.bf16.mxu0 %v3162_v18 }
 0x338   : > { %2141 = vmatmul.mubr.bf16.gmra.mxu0 %v3164_v47 }
 0x339   : > { %2438 = vmatprep.mubr.bf16.mxu0 %v4573_v11 }
 0x340   : > { %3003 = vmatmul.mubr.msk.bf16.vlgmr.msra.gmra.mxu0 %vm2386_vm2, %v3168_v15 }
 0x341   : > { %2448 = vmatprep.mubr.bf16.mxu0 %v4573_v11 }
 0x348   : > { %3004 = vmatmul.mubr.msk.bf16.gmra.mxu0 %vm2386_vm2, %v3170_v28 }
 0x349   : > { %2458 = vmatprep.mubr.bf16.mxu0 %v4573_v11 }
 0x350   : > { %3005 = vmatmul.mubr.msk.bf16.gmra.mxu0 %vm2386_vm2, %v3172_v44 }
 0x351   : > { %2468 = vmatprep.mubr.bf16.mxu0 %v4573_v11 }
 0x358   : > { %3006 = vmatmul.mubr.msk.bf16.gmra.mxu0 %vm2386_vm2, %v3174_v40 }
 0x359   : > { %2634 = vmatprep.mubr.bf16.mxu0 %v4573_v11 }
 0x3c0   : > { %v2072_v56 = vpop.f32.mrf.mxu0 }
 0x3c1   : > { %v2073_v51 = vadd.f32 %v2072_v56, %v1881_v20 }
 0x3c2   : > { %v2074_v37 = vpop.f32.mrf.mxu0 }
 0x3c3   : > { %v2075_v57 = vadd.f32 %v2074_v37, %v1881_v20  ;;  %v2151_v43 = vmax.f32 %v2073_v51, 0.0 }
 0x3c4   : > { %v2076_v4 = vpop.f32.mrf.mxu0 }
 0x3c5   : > { %v2077_v22 = vadd.f32 %v2076_v4, %v1886_v39  ;;  %v2152_v19 = vmax.f32 %v2075_v57, 0.0 }
 0x3c6   : > { %v2078_v49 = vpop.f32.mrf.mxu0 }
 0x3c7   : > { %v2153_v21 = vmax.f32 %v2077_v22, 0.0  ;;  %v2079_v29 = vadd.f32 %v2078_v49, %v1886_v39 }
 0x3c8   : > { %v2082_v16 = vpop.f32.mrf.mxu0 }
 0x3c9   : > { %v4329_v33 = vpack.c.bf16 %v2153_v21, %v2151_v43  ;;  %v2154_v14 = vmax.f32 %v2079_v29, 0.0  ;;  %v2083_v17 = vadd.f32 %v2082_v16, %v1891_v52 }
 0x3ca   : > { %v2084_v32 = vpop.f32.mrf.mxu0 }
 0x3cb   : > { %v4331_v23 = vpack.c.bf16 %v2154_v14, %v2152_v19  ;;  %v2085_v6 = vadd.f32 %v2084_v32, %v1891_v52  ;;  %v2155_v3 = vmax.f32 %v2083_v17, 0.0 }
 0x3cc   : > { %v2086_v45 = vpop.f32.mrf.mxu0 }
 0x3cd   : > { %v2087_v8 = vadd.f32 %v2086_v45, %v1896_v58  ;;  %v2156_v7 = vmax.f32 %v2085_v6, 0.0 }
 0x3ce   : > { %v2088_v46 = vpop.f32.mrf.mxu0 }
 0x3cf   : > { %v2157_v41 = vmax.f32 %v2087_v8, 0.0  ;;  %v2089_v62 = vadd.f32 %v2088_v46, %v1896_v58 }
 0x3d0   : > { %v4333_v61 = vpop.f32.mrf.mxu0 }
 0x3d1   : > { %v4335_v13 = vpack.c.bf16 %v2157_v41, %v2155_v3  ;;  %v2158_v10 = vmax.f32 %v2089_v62, 0.0 }
 0x3d2   : > { %v4337_v54 = vpop.f32.mrf.mxu0 }
 0x3d3   : > { %v4339_v0 = vpack.c.bf16 %v2158_v10, %v2156_v7 }
 0x3d4   : > { %v4341_v2 = vpop.f32.mrf.mxu0 }
 0x3d6   : > { %v4343_v26 = vpop.f32.mrf.mxu0 }
 0x3d8   : > { %v4345_v60 = vpop.f32.mrf.mxu0 }
 0x3da   : > { %v2104_v38 = vpop.f32.mrf.mxu0 }
 0x3dc   : > { %v2106_v48 = vpop.f32.mrf.mxu0 }
 0x3de   : > { %v2108_v27 = vpop.f32.mrf.mxu0 }
 0x3e0   : > { %v2112_v25 = vpop.f32.mrf.mxu0 }
 0x3e2   : > { %v2114_v18 = vpop.f32.mrf.mxu0 }
 0x3e4   : > { %v2116_v47 = vpop.f32.mrf.mxu0 }
 0x3e6   : > { %v2118_v55 = vpop.f32.mrf.mxu0 }
 0x3e8   : > { %v2122_v50 = vpop.f32.mrf.mxu0 }
 0x3e9   : > { %v2123_v62 = vadd.f32 %v2122_v50, %v4298_v5 }
 0x3ea   : > { %v2124_v34 = vpop.f32.mrf.mxu0 }
 0x3eb   : > { %v2125_v45 = vadd.f32 %v2124_v34, %v4298_v5  ;;  %v2117_v34 = vadd.f32 %v2116_v47, %v4309_v42  ;;  %v2105_v5 = vadd.f32 %v2104_v38, %v4314_v53 }
 0x3ec   : > { %v2126_v9 = vpop.f32.mrf.mxu0 }
 0x3ed   : > { %v2127_v8 = vadd.f32 %v2126_v9, %v4300_v63  ;;  %v2172_v10 = vmax.f32 %v2125_v45, 0.0  ;;  %v2164_v38 = vmax.f32 %v2105_v5, 0.0 }
 0x3ee   : > { %v2128_v15 = vpop.f32.mrf.mxu0 }
 0x3ef   : > { %v2129_v29 = vadd.f32 %v2128_v15, %v4300_v63  ;;  %v2173_v15 = vmax.f32 %v2127_v8, 0.0  ;;  %v2109_v63 = vadd.f32 %v2108_v27, %v4317_v31  ;;  %v2103_v27 = vadd.f32 %v4345_v60, %v4314_v53 }
 0x3f0   : > { %v2132_v28 = vpop.f32.mrf.mxu0 }
 0x3f1   : > { %v2133_v32 = vadd.f32 %v2132_v28, %v4289_v59  ;;  %v2166_v47 = vmax.f32 %v2109_v63, 0.0 }
 0x3f2   : > { %v2134_v44 = vpop.f32.mrf.mxu0 }
 0x3f3   : > { %v2135_v22 = vadd.f32 %v2134_v44, %v4289_v59  ;;  %v2175_v7 = vmax.f32 %v2133_v32, 0.0  ;;  %v2115_v59 = vadd.f32 %v2114_v18, %v4306_v30  ;;  %v2107_v18 = vadd.f32 %v2106_v48, %v4317_v31 }
 0x3f4   : > { %v2136_v40 = vpop.f32.mrf.mxu0  ;;  %v2097_v31 = vadd.f32 %v4341_v2, %v4325_v35 }
 0x3f5   : > { %v2137_v43 = vadd.f32 %v2136_v40, %v4294_v36  ;;  %v2176_v6 = vmax.f32 %v2135_v22, 0.0  ;;  %v2171_v40 = vmax.f32 %v2123_v62, 0.0  ;;  %v2168_v50 = vmax.f32 %v2115_v59, 0.0 }
 0x3f6   : > { %v2138_v52 = vpop.f32.mrf.mxu0  ;;  %v2165_v48 = vmax.f32 %v2107_v18, 0.0  ;;  %v2161_v60 = vmax.f32 %v2097_v31, 0.0 }
 0x3f7   : > { %v2139_v37 = vadd.f32 %v2138_v52, %v4294_v36  ;;  %v2177_v46 = vmax.f32 %v2137_v43, 0.0  ;;  %v2174_v36 = vmax.f32 %v2129_v29, 0.0  ;;  %v2169_v52 = vmax.f32 %v2117_v34, 0.0 }
 0x3f8   : > { %v2142_v58 = vpop.f32.mrf.mxu0 }
 0x3f9   : > { %v2143_v4 = vadd.f32 %v2142_v58, %v4279_v1  ;;  %v2178_v16 = vmax.f32 %v2139_v37, 0.0  ;;  %v2195_v28 = vpack.c.bf16 %v2177_v46, %v2175_v7  ;;  %v2194_v44 = vpack.c.bf16 %v2174_v36, %v2172_v10  ;;  %v2248_v7 = vpop.permute.xlu0 %2247 }
 0x3fa   : > { %v2144_v56 = vpop.f32.mrf.mxu0  ;;  %v2193_v58 = vpack.c.bf16 %v2173_v15, %v2171_v40 }
 0x3fb   : > { %v2145_v51 = vadd.f32 %v2144_v56, %v4279_v1  ;;  %v2179_v17 = vmax.f32 %v2143_v4, 0.0  ;;  %v2196_v41 = vpack.c.bf16 %v2178_v16, %v2176_v6 }
 0x3fc   : > { %v2146_v20 = vpop.f32.mrf.mxu0 }
 0x3fd   : > { %v2147_v39 = vadd.f32 %v2146_v20, %v4285_v24  ;;  %v2180_v19 = vmax.f32 %v2145_v51, 0.0  ;;  %v2190_v51 = vpack.c.bf16 %v2166_v47, %v2164_v38 }
 0x3fe   : > { %v2148_v57 = vpop.f32.mrf.mxu0 }
 0x3ff   : > { %v2149_v49 = vadd.f32 %v2148_v57, %v4285_v24  ;;  %v2181_v21 = vmax.f32 %v2147_v39, 0.0  ;;  %v2119_v24 = vadd.f32 %v2118_v55, %v4309_v42  ;;  %v2113_v55 = vadd.f32 %v2112_v25, %v4306_v30 }
 0x400   : > { %v2099_v42 = vadd.f32 %v4343_v26, %v4325_v35  ;;  %v2095_v30 = vadd.f32 %v4337_v54, %v4320_v12  ;;  %v2093_v26 = vadd.f32 %v4333_v61, %v4320_v12  ;;  %v2163_v39 = vmax.f32 %v2103_v27, 0.0  ;;  %v3167_v12 = vld [vmem:[%s4502_s6] sm:$0xff]   ;;  %v3169_v35 = vld [vmem:[%s4502_s6 + $0x8] sm:$0xff]   ;;  %v4396_v61 = vpop.f32.mrf.mxu0 }
 0x401   : > { %v2182_v14 = vmax.f32 %v2149_v49, 0.0  ;;  %v2197_v3 = vpack.c.bf16 %v2181_v21, %v2179_v17  ;;  %v2170_v9 = vmax.f32 %v2119_v24, 0.0  ;;  %v2167_v20 = vmax.f32 %v2113_v55, 0.0 }
 0x402   : > { %v2162_v37 = vmax.f32 %v2099_v42, 0.0  ;;  %v2160_v53 = vmax.f32 %v2095_v30, 0.0  ;;  %v2189_v4 = vpack.c.bf16 %v2165_v48, %v2163_v39  ;;  %v2159_v54 = vmax.f32 %v2093_v26, 0.0 }
 0x403   : > { %v2198_v1 = vpack.c.bf16 %v2182_v14, %v2180_v19  ;;  %v2192_v56 = vpack.c.bf16 %v2170_v9, %v2168_v50  ;;  %v2191_v25 = vpack.c.bf16 %v2169_v52, %v2167_v20  ;;  %v2238_v9 = vpop.permute.xlu0 %2237 }
 0x404   : > { %v2188_v57 = vpack.c.bf16 %v2162_v37, %v2160_v53  ;;  %v2187_v22 = vpack.c.bf16 %v2161_v60, %v2159_v54 }
 0x405   : > { %2279 = vmatprep.subr.bf16.mxu1 %v2198_v1 }
 0x406   : > { %2280 = vmatpush1.bf16.msra.mxu1 %v2197_v3 }
 0x407   : > { %2281 = vmatprep.subr.bf16.mxu1 %v2196_v41  ;;  %v2253_v41 = vpop.permute.xlu1 %2252  ;;  %v2228_v27 = vpop.permute.xlu0 %2227 }
 0x40a   : > { %2282 = vmatpush1.bf16.msra.mxu1 %v2195_v28 }
 0x40b   : > { %2283 = vmatprep.subr.bf16.mxu1 %v2194_v44  ;;  %v2243_v15 = vpop.permute.xlu1 %2242 }
 0x40e   : > { %2284 = vmatpush1.bf16.msra.mxu1 %v2193_v58 }
 0x40f   : > { %2285 = vmatprep.subr.bf16.mxu1 %v2192_v56  ;;  %v2233_v52 = vpop.permute.xlu1 %2232 }
 0x412   : > { %2286 = vmatpush1.bf16.msra.mxu1 %v2191_v25 }
 0x413   : > { %2287 = vmatprep.subr.bf16.mxu1 %v2190_v51 }
 0x416   : > { %2288 = vmatpush1.bf16.msra.mxu1 %v2189_v4  ;;  %v2223_v4 = vpop.permute.xlu1 %2222 }
 0x417   : > { %2289 = vmatprep.subr.bf16.mxu1 %v2188_v57 }
 0x41a   : > { %2290 = vmatpush1.bf16.msra.mxu1 %v2187_v22 }
 0x41b   : > { %2291 = vmatprep.subr.bf16.mxu1 %v4339_v0 }
 0x41e   : > { %2292 = vmatpush1.bf16.msra.mxu1 %v4335_v13  ;;  %v4398_v13 = vpop.f32.mrf.mxu0 }
 0x41f   : > { %2293 = vmatprep.subr.bf16.mxu1 %v4331_v23  ;;  %v3171_v23 = vld [vmem:[%s4502_s6 + $0x10] sm:$0xff]  }
 0x420   : > { %v4400_v0 = vpop.f32.mrf.mxu0 }
 0x422   : > { %2294 = vmatpush1.bf16.msra.mxu1 %v4329_v33  ;;  %v3173_v33 = vld [vmem:[%s4502_s6 + $0x18] sm:$0xff]   ;;  %v4402_v2 = vpop.f32.mrf.mxu0 }
 0x424   : > { %v4404_v49 = vpop.f32.mrf.mxu0 }
 0x425   : > { %2312 = vmatmul.mubr.bf16.vlgmr.msra.gmra.mxu1 %v3167_v12 }
 0x426   : > { %2321 = vmatprep.mubr.bf16.mxu1 %v4573_v11  ;;  %v4406_v43 = vpop.f32.mrf.mxu0 }
 0x428   : > { %v4408_v21 = vpop.f32.mrf.mxu0 }
 0x42a   : > { %v2456_v16 = vpop.f32.mrf.mxu0 }
 0x42c   : > { %v2460_v32 = vpop.f32.mrf.mxu0 }
 0x42d   : > { %2322 = vmatmul.mubr.bf16.gmra.mxu1 %v3169_v35 }
 0x42e   : > { %2331 = vmatprep.mubr.bf16.mxu1 %v4573_v11  ;;  %v2462_v6 = vpop.f32.mrf.mxu0 }
 0x430   : > { %v2464_v46 = vpop.f32.mrf.mxu0 }
 0x432   : > { %v2466_v36 = vpop.f32.mrf.mxu0 }
 0x434   : > { %v2470_v10 = vpop.f32.mrf.mxu0 }
 0x435   : > { %2332 = vmatmul.mubr.bf16.gmra.mxu1 %v3171_v23 }
 0x436   : > { %2341 = vmatprep.mubr.bf16.mxu1 %v4573_v11  ;;  %v2472_v63 = vpop.f32.mrf.mxu0 }
 0x438   : > { %v2474_v40 = vpop.f32.mrf.mxu0 }
 0x43a   : > { %v2476_v38 = vpop.f32.mrf.mxu0 }
 0x43d   : > { %2342 = vmatmul.mubr.bf16.gmra.mxu1 %v3173_v33  ;;  %v2218_v33 = vpop.permute.xlu0 %2217 }
 0x43e   : > { %2546 = vmatprep.mubr.bf16.mxu1 %v4573_v11 }
 0x4e5   : > { %v4410_v29 = vpop.f32.mrf.mxu1 }
 0x4e7   : > { %v2315_v19 = vpop.f32.mrf.mxu1 }
 0x4e9   : > { %v2317_v14 = vpop.f32.mrf.mxu1 }
 0x4eb   : > { %v2319_v17 = vpop.f32.mrf.mxu1 }
 0x4ec   : > { %v2320_v12 = vadd.f32 %v2319_v17, %v2223_v4  ;;  %v4425_v17 = vld [vmem:[%s503_s30] sm:$0xff] }
 0x4ed   : > { %v2323_v45 = vpop.f32.mrf.mxu1 }
 0x4ef   : > { %v2325_v1 = vpop.f32.mrf.mxu1 }
 0x4f0   : > { %v2326_v39 = vadd.f32 %v2325_v1, %v2228_v27  ;;  %v2318_v1 = vadd.f32 %v2317_v14, %v2223_v4 }
 0x4f1   : > { %v2327_v8 = vpop.f32.mrf.mxu1 }
 0x4f2   : > { %v2328_v57 = vadd.f32 %v2327_v8, %v2233_v52  ;;  %v2482_v8 = vmul.f32 %v4402_v2, %v2320_v12 }
 0x4f3   : > { %v2329_v3 = vpop.f32.mrf.mxu1 }
 0x4f4   : > { %v2330_v31 = vadd.f32 %v2329_v3, %v2233_v52 }
 0x4f5   : > { %v2333_v24 = vpop.f32.mrf.mxu1 }
 0x4f6   : > { %v2334_v51 = vadd.f32 %v2333_v24, %v2238_v9  ;;  %v2486_v35 = vmul.f32 %v2456_v16, %v2330_v31  ;;  %v2484_v24 = vmul.f32 %v4406_v43, %v2326_v39  ;;  %v2314_v16 = vadd.f32 %v4410_v29, %v2218_v33 }
 0x4f7   : > { %v2335_v62 = vpop.f32.mrf.mxu1  ;;  %v2481_v43 = vmul.f32 %v4400_v0, %v2318_v1  ;;  %v2503_v0 = vld [vmem:[%s4504_s8] sm:$0xf] }
 0x4f8   : > { %v2336_v47 = vadd.f32 %v2335_v62, %v2238_v9  ;;  %v2487_v3 = vmul.f32 %v2460_v32, %v2334_v51 }
 0x4f9   : > { %v2337_v59 = vpop.f32.mrf.mxu1 }
 0x4fa   : > { %v2338_v20 = vadd.f32 %v2337_v59, %v2243_v15  ;;  %v2488_v53 = vmul.f32 %v2462_v6, %v2336_v47  ;;  %v2485_v6 = vmul.f32 %v4408_v21, %v2328_v57  ;;  %v4423_v21 = vld [vmem:[%s503_s30 + $0x8] sm:$0xff]  ;;  %s3203_s30 = sshll.u32 %s3262_s25, 4  ;;  %s3204_s30 = int_to_ptr.vmem [resolvable:$false] %s3203_s30 }
 0x4fb   : > { %v2339_v34 = vpop.f32.mrf.mxu1  ;;  %v2657_v29 = vpack.c.bf16 %v4423_v21, %v4423_v21  ;;  %v3176_v59 = vld [vmem:[%s4506_s10 + $0x8] ss:$0 sps:$4 sm:$0xff]   ;;  %s3205_s29 = scalar_lea.vmem %s3204_s30, 512  ;;  %p3206_p3 = scmp.lt.s32.totalorder %s2807_s16, %s3204_s30 }
 0x4fc   : > { %v2340_v5 = vadd.f32 %v2339_v34, %v2243_v15  ;;  %v2489_v54 = vmul.f32 %v2464_v46, %v2338_v20  ;;  %v2498_v46 = vpack.c.bf16 %v2486_v35, %v2484_v24  ;;  %v3178_v20 = vld [vmem:[%s4505_s9 + $0x8] ss:$0 sps:$4 sm:$0xff]   ;;  %p3207_p4 = scmp.lt.s32.totalorder %s3205_s29, %s3199_s26 }
 0x4fd   : > { %v2343_v28 = vpop.f32.mrf.mxu1 }
 0x4fe   : > { %v2344_v58 = vadd.f32 %v2343_v28, %v2248_v7  ;;  %v2490_v48 = vmul.f32 %v2466_v36, %v2340_v5  ;;  %v2316_v36 = vadd.f32 %v2315_v19, %v2218_v33  ;;  %v2499_v62 = vpack.c.bf16 %v2489_v54, %v2487_v3  ;;  %p3208_p5 = por %p3207_p4, %p3206_p3 }
 0x4ff   : > { %v2345_v44 = vpop.f32.mrf.mxu1 }
 0x500   : > { %v2346_v50 = vadd.f32 %v2345_v44, %v2248_v7  ;;  %v2491_v26 = vmul.f32 %v2470_v10, %v2344_v58  ;;  %v2500_v23 = vpack.c.bf16 %v2490_v48, %v2488_v53  ;;  %v2480_v19 = vmul.f32 %v4398_v13, %v2316_v36  ;;  %v2508_v10 = vpop.permute.xlu0 %2507  ;;  %v3177_v58 = vld [vmem:[%s4505_s9] sm:$0xff]   ;;  %v2570_v48 = vpop.permute.xlu1 %2569  ;;  %p3209_p7 = pnand %p3208_p5, %p3202_p2 }
 0x501   : > { %v2347_v55 = vpop.f32.mrf.mxu1 }
 0x502   : > { %v2348_v18 = vadd.f32 %v2347_v55, %v2253_v41  ;;  %v2492_v25 = vmul.f32 %v2472_v63, %v2346_v50  ;;  %v2496_v2 = vpack.c.bf16 %v2482_v8, %v2480_v19 }
 0x503   : > { %v2349_v42 = vpop.f32.mrf.mxu1 }
 0x504   : > { %v2350_v56 = vadd.f32 %v2349_v42, %v2253_v41  ;;  %v2493_v30 = vmul.f32 %v2474_v40, %v2348_v18  ;;  %v2324_v41 = vadd.f32 %v2323_v45, %v2228_v27  ;;  %v2479_v45 = vmul.f32 %v4396_v61, %v2314_v16  ;;  %v3175_v61 = vld [vmem:[%s4506_s10] sm:$0xff]  }
 0x506   : > { %v2494_v37 = vmul.f32 %v2476_v38, %v2350_v56  ;;  %v2501_v22 = vpack.c.bf16 %v2493_v30, %v2491_v26  ;;  %v2483_v32 = vmul.f32 %v4404_v49, %v2324_v41  ;;  %v2656_v49 = vpack.c.bf16 %v4425_v17, %v4425_v17 }
 0x507   : > { %v2495_v13 = vpack.c.bf16 %v2481_v43, %v2479_v45 }
 0x508   : > { %v2502_v60 = vpack.c.bf16 %v2494_v37, %v2492_v25  ;;  %v2497_v14 = vpack.c.bf16 %v2485_v6, %v2483_v32  ;;  %v2691_v7 = vsel %vm2399_vm1, %v2656_v49, 0  ;;  %v2664_v25 = vpop.permute.xlu0 %2663 }
 0x50a   : > { %2522 = vmatprep.subr.bf16.mxu1 %v2502_v60 }
 0x50b   : > { %2523 = vmatpush1.bf16.msra.mxu1 %v2501_v22 }
 0x50c   : > { %2524 = vmatprep.subr.bf16.mxu1 %v2500_v23  ;;  %v2669_v35 = vpop.permute.xlu0 %2668 }
 0x50f   : > { %2525 = vmatpush1.bf16.msra.mxu1 %v2499_v62 }
 0x510   : > { %2526 = vmatprep.subr.bf16.mxu1 %v2498_v46 }
 0x513   : > { %2527 = vmatpush1.bf16.msra.mxu1 %v2497_v14 }
 0x514   : > { %2528 = vmatprep.subr.bf16.mxu1 %v2496_v2 }
 0x517   : > { %2529 = vmatpush1.bf16.msra.mxu1 %v2495_v13 }
 0x518   : > { %3015 = vmatprep.subr.msk.bf16.mxu1 %vm2399_vm1, %v2657_v29 }
 0x51a   : > { %3007 = vmatmul.mubr.msk.bf16.vlgmr.msra.gmra.mxu1 %vm2510_vm3, %v2503_v0 }
 0x51b   : > { %2711 = vmatpush1.bf16.msra.mxu1 %v2691_v7  ;;  %2728 = vmatprep.mubr.bf16.mxu1 %v4573_v11 }
 0x522   : > { %3016 = vmatmul.mubr.msk.bf16.vlgmr.msra.gmra.mxu1 %vm2386_vm2, %v3175_v61 }
 0x523   : > { %2738 = vmatprep.mubr.bf16.mxu1 %v4573_v11 }
 0x52a   : > { %3017 = vmatmul.mubr.msk.bf16.gmra.mxu1 %vm2386_vm2, %v3176_v59  ;;  %v2580_v59 = vpop.permute.xlu0 %2579 }
 0x5da   : > { %v2548_v34 = vpop.f32.mrf.mxu1 }
 0x5db   : > { %v2549_v15 = vadd.f32 %v2548_v34, %v2508_v10 }
 0x5dc   : > { %v2550_v28 = vpop.f32.mrf.mxu1 }
 0x5dd   : > { %v2555_v63 = vmax.f32 %v2549_v15, 0.0  ;;  %v2551_v9 = vadd.f32 %v2550_v28, %v2508_v10 }
 0x5de   : > { %v2552_v44 = vpop.f32.mrf.mxu1 }
 0x5df   : > { %v2562_v55 = vpack.c.bf16 %v2555_v63, %v2555_v63  ;;  %v2556_v40 = vmax.f32 %v2551_v9, 0.0 }
 0x5e0   : > { %v2553_v5 = vpop.f32.mrf.mxu1 }
 0x5e1   : > { %v2563_v50 = vpack.c.bf16 %v2556_v40, %v2556_v40  ;;  %v2597_v52 = vsel %vm2399_vm1, %v2562_v55, 0 }
 0x5e2   : > { %v2730_v18 = vpop.f32.mrf.mxu1 }
 0x5e3   : > { %3010 = vmatprep.subr.msk.bf16.mxu0 %vm2399_vm1, %v2563_v50  ;;  %v2731_v51 = vadd.f32 %v2730_v18, %v2664_v25 }
 0x5e4   : > { %2617 = vmatpush1.bf16.msra.mxu0 %v2597_v52  ;;  %v2732_v42 = vpop.f32.mrf.mxu1 }
 0x5e5   : > { %v2733_v53 = vadd.f32 %v2732_v42, %v2664_v25 }
 0x5e6   : > { %v2734_v47 = vpop.f32.mrf.mxu1 }
 0x5e7   : > { %3011 = vmatmul.mubr.msk.bf16.vlgmr.msra.gmra.mxu0 %vm2386_vm2, %v3177_v58  ;;  %v2735_v33 = vadd.f32 %v2734_v47, %v2669_v35 }
 0x5e8   : > { %v2736_v56 = vpop.f32.mrf.mxu1  ;;  %2644 = vmatprep.mubr.bf16.mxu0 %v4573_v11  ;;  %v2575_v11 = vpop.permute.xlu1 %2574 }
 0x5e9   : > { %v2737_v24 = vadd.f32 %v2736_v56, %v2669_v35 }
 0x5ea   : > { %v2740_v27 = vpop.f32.mrf.mxu1 }
 0x5ec   : > { %v2742_v30 = vpop.f32.mrf.mxu1  ;;  %v2674_v13 = vpop.permute.xlu1 %2673 }
 0x5ed   : > { %v2741_v0 = vadd.f32 %v2740_v27, %v2674_v13  ;;  %v2743_v10 = vadd.f32 %v2742_v30, %v2674_v13 }
 0x5ee   : > { %v2744_v38 = vpop.f32.mrf.mxu1 }
 0x5ef   : > { %3012 = vmatmul.mubr.msk.bf16.gmra.mxu0 %vm2386_vm2, %v3178_v20 }
 0x5f0   : > { %v2745_v31 = vpop.f32.mrf.mxu1 }
 0x6a7   : > { %v2636_v37 = vpop.f32.mrf.mxu0 }
 0x6a8   : > { %v2637_v26 = vadd.f32 %v2636_v37, %v2570_v48 }
 0x6a9   : > { %v2638_v39 = vpop.f32.mrf.mxu0 }
 0x6aa   : > { %v2747_v60 = vadd.f32 %v2731_v51, %v2637_v26  ;;  %v2639_v4 = vadd.f32 %v2638_v39, %v2570_v48 }
 0x6ab   : > { %v2640_v57 = vpop.f32.mrf.mxu0 }
 0x6ac   : > { %v3018_v54 = vmul.f32 -1.442695, %v2747_v60  ;;  %v2748_v22 = vadd.f32 %v2733_v53, %v2639_v4  ;;  %v2641_v12 = vadd.f32 %v2640_v57, %v2575_v11 }
 0x6ad   : > { %v2642_v23 = vpop.f32.mrf.mxu0 }
 0x6ae   : > { %3179 = vpow2.f32 %v3018_v54  ;;  %v3019_v41 = vmul.f32 -1.442695, %v2748_v22  ;;  %v2643_v3 = vadd.f32 %v2642_v23, %v2575_v11  ;;  %v2761_v1 = vadd.f32 %v2735_v33, %v2641_v12 }
 0x6af   : > { %v2646_v36 = vpop.f32.mrf.mxu0 }
 0x6b0   : > { %3181 = vpow2.f32 %v3019_v41  ;;  %v2762_v62 = vadd.f32 %v2737_v24, %v2643_v3  ;;  %v3020_v46 = vmul.f32 -1.442695, %v2761_v1  ;;  %v2647_v34 = vadd.f32 %v2646_v36, %v2580_v59 }
 0x6b1   : > { %v2648_v6 = vpop.f32.mrf.mxu0 }
 0x6b2   : > { %v3021_v32 = vmul.f32 -1.442695, %v2762_v62  ;;  %3183 = vpow2.f32 %v3020_v46  ;;  %v2649_v9 = vadd.f32 %v2648_v6, %v2580_v59 }
 0x6b3   : > { %v2650_v8 = vpop.f32.mrf.mxu0 }
 0x6b4   : > { %3185 = vpow2.f32 %v3021_v32 }
 0x6b5   : > { %v2651_v16 = vpop.f32.mrf.mxu0 }
 0x6bb   : > { %v3180_v19 = vpop.eup %3179 }
 0x6bc   : > { %v2755_v43 = vadd.f32 1.0, %v3180_v19 }
 0x6bd   : > { %v3182_v14 = vpop.eup %3181 }
 0x6be   : > { %3187 = vrcp.f32 %v2755_v43  ;;  %v2756_v2 = vadd.f32 1.0, %v3182_v14 }
 0x6bf   : > { %v3184_v45 = vpop.eup %3183 }
 0x6c0   : > { %3189 = vrcp.f32 %v2756_v2  ;;  %v2769_v49 = vadd.f32 1.0, %v3184_v45 }
 0x6c1   : > { %v3186_v29 = vpop.eup %3185 }
 0x6c2   : > { %v2770_v7 = vadd.f32 1.0, %v3186_v29  ;;  %3191 = vrcp.f32 %v2769_v49 }
 0x6c4   : > { %3193 = vrcp.f32 %v2770_v7 }
 0x6cb   : > { %v3188_v61 = vpop.eup %3187 }
 0x6cc   : > { %v2775_v15 = vmul.f32 %v3188_v61, %v2741_v0 }
 0x6cd   : > { %v3190_v28 = vpop.eup %3189 }
 0x6ce   : > { %v2777_v63 = vadd.f32 %v2775_v15, %v2647_v34  ;;  %v2776_v44 = vmul.f32 %v3190_v28, %v2743_v10 }
 0x6cf   : > { %v3192_v40 = vpop.eup %3191 }
 0x6d0   : > { %3195 = vtanh.f32 %v2777_v63  ;;  %v2778_v55 = vadd.f32 %v2776_v44, %v2649_v9  ;;  %v2781_v50 = vsub.f32 1.0, %v3192_v40  ;;  %v2785_v42 = vmul.f32 %v3192_v40, %v4425_v17 }
 0x6d1   : > { %v3194_v5 = vpop.eup %3193 }
 0x6d2   : > { %3197 = vtanh.f32 %v2778_v55  ;;  %v2782_v52 = vsub.f32 1.0, %v3194_v5  ;;  %v2786_v27 = vmul.f32 %v3194_v5, %v4423_v21 }
 0x6dd   : > { %v3196_v18 = vpop.eup %3195 }
 0x6de   : > { %v2783_v58 = vmul.f32 %v3196_v18, %v2781_v50 }
 0x6df   : > { %v3198_v47 = vpop.eup %3197 }
 0x6e0   : > { %v2784_v56 = vmul.f32 %v3198_v47, %v2782_v52  ;;  %v2787_v20 = vadd.f32 %v2785_v42, %v2783_v58 }
 0x6e2   : > { %v2788_v30 = vadd.f32 %v2786_v27, %v2784_v56  ;;  %2789 = vst [vmem:[%s491_s15] sm:$0xff] %v2787_v20 }
 0x6e4   : > { %2790 = vst [vmem:[%s491_s15 + $0x8] sm:$0xff] %v2788_v30 }
 0x6e5   : > { %3212 = shalt.err (!%p3209_p7)
}
 0x6e6   : > { %s3213_s1 = scalar_lea.hbm %s2804_s18, 256  ;;  %s3217_s15 = scalar_lea.hbm %s4508_s12, 512 }
 0x6e7   : > { %p3214_p10 = scmp.ne.s32.totalorder %s2804_s18, %s3213_s1  ;;  %p3218_p13 = scmp.lt.s32.totalorder %s2804_s18, %s4508_s12 }
 0x6e8   : > { %p3219_p0 = scmp.lt.s32.totalorder %s3217_s15, %s3213_s1 }
 0x6e9   : > { %p3215_p11 = pnand %p3214_p10, %p3367_p6 }
 0x6ea   : > { %p3220_p1 = por %p3219_p0, %p3218_p13 }
 0x6eb   : > { %p3216_p12 = pneg %p3215_p11 }
 0x6ed   : > { %p3221_p9 = pnand %p3220_p1, %p3216_p12 }
 0x6ef   : > { %3224 = shalt.err (!%p3221_p9)
}
 0x6f0   : > { %3029 = dma.vmem_to_hbm [thread:$0]  (%p3367_p6), %s2807_s16, 256, %s2804_s18, %s2792_s0  }
 0x6f1 PF: > { %s2818_s26 = sand.u32 1, %s3247_s21   ;;  %p4575_p2 = scmp.ge.s32.totalorder %s3259_s24, 2 }
 0x6f2   : > { %s2819_s25 = scalar_lea.sflag [#allocation4], %s2818_s26 }
 0x6f3   : > { %p3032_p3 = pnand %p4575_p2, %p3371_p8 }
 0x6f5   : > { %p3033_p4 = pneg %p3032_p3 }
 0x6f7   : > { %3242 = dma.done.wait (%p3033_p4), %s2819_s25, 256  }
 0x6f8   : > { %3244 = vsyncadd (%p3033_p4), %s2819_s25, 4294967040  ;;  %s4576_s1 = sld [smem:[#allocation6_spill]]  ;;  %p22_p9 = scmp.ge.s32.totalorder %s3353_s27, 4  }
 0x6f9   : > { %s4577_s21 = smov %s3251_s22  ;;  %s4578_s22 = smov %s3255_s23 }
 0x6fa   : > { %s4580_s24 = smov %s3353_s27  ;;  %24 = sbr.rel (!%p22_p9) target bundleno = 6 (0x6), region = 152 }
 0x6fe   : > { %s4579_s23 = smov %s4576_s1 }
 0x6ff   :  { %2824 = vsyncpa [#allocation4], 1 }
 0x700   :  { %2826 = vsyncpa [#allocation4 + $0x1], 1 }

</bundles_post_ra>
